<compile_context>
chip_gen: v6e
topology: v6e:2x2x1
jax: 0.10.0
libtpu: 0.0.40
codegen_flags: <defaults>
</compile_context>

<pallas_src>
import math

import jax
import jax.numpy as jnp
from jax.experimental import pallas as pl
from jax.experimental.pallas import tpu as pltpu

_LANE = 128
_SUBLANE = 8
_LOG_1EM45 = math.log(1e-45)    # ~= -103.2789, matches torch's (mask + 1e-45).log()
_NEG_BIG = -1e30                # additive mask for *padded* vocab lanes (sliced away)
_TILE_V_MAX = 2048              # vocab tile (lanes) streamed per grid step


def _round_up(x, m):
    return ((x + m - 1) // m) * m


def _invariant_spec(shape):
    """Full-array block, constant index_map; single-buffered when supported."""
    nd = len(shape)
    idx = lambda j, _nd=nd: (0,) * _nd
    try:
        return pl.BlockSpec(shape, idx, pipeline_mode=pl.Buffered(1))
    except TypeError:           # older jax without pipeline_mode kwarg
        return pl.BlockSpec(shape, idx)


def _decode_step_kernel(emb_ref, h_ref, c_ref, mask_ref, enc_ref, enc_t_ref,
                        w_ih_ref, w_hh_ref, b_ref,
                        w_cat_c_ref, w_cat_h_ref, b_cat_ref,
                        w_out_ref, b_out_ref,
                        logits_ref, lse_ref, h_out_ref, c_out_ref,
                        hid_sc, m_sc, l_sc):
    j = pl.program_id(0)
    bf16 = jnp.bfloat16

    # ---- step-level work: run once, on the first vocab tile ----
    @pl.when(j == 0)
    def _prologue():
        Hp = h_ref.shape[-1]

        # LSTM cell (PyTorch gate order i, f, g, o; each gate 128-lane aligned)
        x = emb_ref[...].astype(bf16)                     # (Bp, Cp)
        h_prev = h_ref[...]                               # (Bp, Hp) f32
        c_prev = c_ref[...]                               # (Bp, Hp) f32
        gates = (jnp.dot(x, w_ih_ref[...], preferred_element_type=jnp.float32)
                 + jnp.dot(h_prev.astype(bf16), w_hh_ref[...],
                           preferred_element_type=jnp.float32)
                 + b_ref[...])                            # (Bp, 4*Hp) f32
        i_g = jax.nn.sigmoid(gates[:, 0 * Hp:1 * Hp])
        f_g = jax.nn.sigmoid(gates[:, 1 * Hp:2 * Hp])
        g_g = jnp.tanh(gates[:, 2 * Hp:3 * Hp])
        o_g = jax.nn.sigmoid(gates[:, 3 * Hp:4 * Hp])
        c_new = f_g * c_prev + i_g * g_g                  # padded lanes stay 0
        h_new = o_g * jnp.tanh(c_new)
        h_out_ref[...] = h_new
        c_out_ref[...] = c_new

        # dot attention; scores use pre-transposed enc_T so the contraction
        # (Hp) sits on RHS sublanes (no per-step XLU relayout of enc).
        mask3 = mask_ref[...]                             # (Bp, 1, Sp) f32
        h3 = h_new[:, None, :].astype(bf16)               # (Bp, 1, Hp)
        scores = jnp.einsum('bqh,bhs->bqs', h3, enc_t_ref[...],
                            preferred_element_type=jnp.float32)    # (Bp, 1, Sp)

        # masked_softmax (AllenNLP / torch semantics): softmax(logits * mask),
        # re-mask, renormalize — collapsed into a single exact normalization.
        masked = scores * mask3
        m = jnp.max(masked, axis=-1, keepdims=True)
        e = jnp.exp(masked - m) * mask3
        p = e / (jnp.sum(e, axis=-1, keepdims=True) + 1e-13)        # (Bp, 1, Sp)

        ctx3 = jnp.einsum('bqs,bsh->bqh', p.astype(bf16), enc_ref[...],
                          preferred_element_type=jnp.float32)       # (Bp, 1, Hp)
        context = ctx3[:, 0, :]                                     # (Bp, Hp)

        # concat layer without concat: two matmuls summed (no relayout)
        new_hidden = jnp.tanh(
            jnp.dot(context.astype(bf16), w_cat_c_ref[...],
                    preferred_element_type=jnp.float32)
            + jnp.dot(h_new.astype(bf16), w_cat_h_ref[...],
                      preferred_element_type=jnp.float32)
            + b_cat_ref[...])                                       # (Bp, Hp)
        hid_sc[...] = new_hidden.astype(hid_sc.dtype)

        # online-logsumexp state
        m_sc[...] = jnp.full(m_sc.shape, -jnp.inf, m_sc.dtype)
        l_sc[...] = jnp.zeros(l_sc.shape, l_sc.dtype)

    # ---- per-vocab-tile: streamed output projection + online logsumexp ----
    # b_out_ref already contains bias + additive log-mask (folded at pad time).
    blk = (jnp.dot(hid_sc[...], w_out_ref[...],
                   preferred_element_type=jnp.float32)
           + b_out_ref[...])                                        # (Bp, TILE_V)
    logits_ref[...] = blk

    bmax = jnp.max(blk, axis=-1, keepdims=True)
    m_prev = m_sc[...]
    m_new = jnp.maximum(m_prev, bmax)
    l_sc[...] = (l_sc[...] * jnp.exp(m_prev - m_new)
                 + jnp.sum(jnp.exp(blk - m_new), axis=-1, keepdims=True))
    m_sc[...] = m_new

    @pl.when(j == pl.num_programs(0) - 1)
    def _finalize():
        lse = m_sc[...] + jnp.log(l_sc[...])                        # (Bp, 1)
        lse_ref[...] = jnp.broadcast_to(lse, lse_ref.shape)         # lane-dense


def pad_params(params, tile_v_max=_TILE_V_MAX):
    """Lane-pad / cast all parameters once (outside the per-step call)."""
    V, C = params['embedding'].shape
    H = params['w_hh'].shape[0]
    Hp = _round_up(H, _LANE)
    Cp = _round_up(C, _LANE)
    tile_v = min(tile_v_max, _round_up(V, _LANE))
    Vp = _round_up(V, tile_v)
    f32, bf16 = jnp.float32, jnp.bfloat16

    # Embedding table kept UNPADDED (V, C) in HBM; only gathered rows get padded.
    emb = params['embedding'].astype(f32)

    # Per-gate padding so each gate occupies a full 128-lane block.
    w_ih4 = params['w_ih'].reshape(C, 4, H)
    w_ih_p = (jnp.zeros((Cp, 4, Hp), f32).at[:C, :, :H].set(w_ih4)
              .reshape(Cp, 4 * Hp).astype(bf16))
    w_hh4 = params['w_hh'].reshape(H, 4, H)
    w_hh_p = (jnp.zeros((Hp, 4, Hp), f32).at[:H, :, :H].set(w_hh4)
              .reshape(Hp, 4 * Hp).astype(bf16))
    b4 = params['b_gates'].reshape(4, H)
    b_p = jnp.zeros((4, Hp), f32).at[:, :H].set(b4).reshape(1, 4 * Hp)

    # concat-layer weight split: rows [0:H] multiply context, rows [H:2H] multiply h.
    w_cat_c = jnp.zeros((Hp, Hp), f32).at[:H, :H].set(params['w_cat'][:H]).astype(bf16)
    w_cat_h = jnp.zeros((Hp, Hp), f32).at[:H, :H].set(params['w_cat'][H:]).astype(bf16)
    b_cat_p = jnp.zeros((1, Hp), f32).at[:, :H].set(params['b_cat'])

    w_out_p = jnp.zeros((Hp, Vp), f32).at[:H, :V].set(params['w_out']).astype(bf16)

    # Fold the additive log-mask into the output bias:
    #   0 for allowed, log(1e-45) for PAD/BOS (torch semantics),
    #   -1e30 for padded vocab lanes (never win the row max; sliced away).
    log_valid = jnp.where(params['output_mask'][0] > 0, 0.0,
                          jnp.float32(_LOG_1EM45))
    b_out_masked = (jnp.full((1, Vp), _NEG_BIG, f32)
                    .at[0, :V].set(params['b_out'][0] + log_valid))

    return dict(embedding=emb, w_ih=w_ih_p, w_hh=w_hh_p, b_gates=b_p,
                w_cat_c=w_cat_c, w_cat_h=w_cat_h, b_cat=b_cat_p,
                w_out=w_out_p, b_out_masked=b_out_masked,
                H=H, C=C, V=V, Hp=Hp, Cp=Cp, Vp=Vp, tile_v=tile_v)


def prepare_encoder(encoder_hidden_states, encoder_lens, pp):
    """Per-sequence prep, hoisted OUT of the decode loop: pad encoder states,
    build the length mask, and pre-transpose enc for the score matmul."""
    B, S, H = encoder_hidden_states.shape
    assert H == pp['H']
    Hp = pp['Hp']
    Bp = _round_up(B, _SUBLANE)
    Sp = _round_up(S, _SUBLANE)
    f32, bf16 = jnp.float32, jnp.bfloat16

    enc = (jnp.zeros((Bp, Sp, Hp), f32)
           .at[:B, :S, :H].set(encoder_hidden_states).astype(bf16))   # (Bp, Sp, Hp)
    enc_t = jnp.transpose(enc, (0, 2, 1))                             # (Bp, Hp, Sp)
    lens_p = jnp.zeros((Bp,), jnp.int32).at[:B].set(encoder_lens.astype(jnp.int32))
    pos = jnp.arange(Sp, dtype=jnp.int32)[None, :]
    mask = (pos < lens_p[:, None]).astype(f32)[:, None, :]            # (Bp, 1, Sp)
    return dict(enc=enc, enc_t=enc_t, mask=mask, B=B, S=S, Bp=Bp, Sp=Sp)


def char_decoding_step(input_, previous_state, enc_prep, pp):
    """
    input_: (B,) int32
    previous_state: tuple (h, c), each (num_layers=1, B, H) float32
    enc_prep: dict from prepare_encoder() (built once per sequence)
    pp: padded parameter dict from pad_params()
    returns: (output_log_probs (B, V), (h_new (1, B, H), c_new (1, B, H)))
    """
    h0, c0 = previous_state
    B = input_.shape[0]
    H, C, V = pp['H'], pp['C'], pp['V']
    Hp, Cp, Vp, tile_v = pp['Hp'], pp['Cp'], pp['Vp'], pp['tile_v']
    Bp, Sp = enc_prep['Bp'], enc_prep['Sp']
    assert enc_prep['B'] == B
    f32 = jnp.float32

    # embedding gather = glue, outside the kernel (table stays unpadded in HBM)
    emb = jnp.zeros((Bp, Cp), f32).at[:B, :C].set(pp['embedding'][input_])
    h_in = jnp.zeros((Bp, Hp), f32).at[:B, :H].set(h0[0])
    c_in = jnp.zeros((Bp, Hp), f32).at[:B, :H].set(c0[0])

    inputs = (emb, h_in, c_in, enc_prep['mask'], enc_prep['enc'], enc_prep['enc_t'],
              pp['w_ih'], pp['w_hh'], pp['b_gates'],
              pp['w_cat_c'], pp['w_cat_h'], pp['b_cat'],
              pp['w_out'], pp['b_out_masked'])

    n_vt = Vp // tile_v

    in_specs = ([_invariant_spec(a.shape) for a in inputs[:12]]
                + [pl.BlockSpec((Hp, tile_v), lambda j: (0, j)),     # w_out tiles
                   pl.BlockSpec((1, tile_v), lambda j: (0, j))])     # bias+logmask

    out_specs = (
        pl.BlockSpec((Bp, tile_v), lambda j: (0, j)),   # unnormalized masked logits
        pl.BlockSpec((Bp, _LANE), lambda j: (0, 0)),    # lse (lane-broadcast)
        pl.BlockSpec((Bp, Hp), lambda j: (0, 0)),       # h_new
        pl.BlockSpec((Bp, Hp), lambda j: (0, 0)),       # c_new
    )
    out_shapes = (
        jax.ShapeDtypeStruct((Bp, Vp), f32),
        jax.ShapeDtypeStruct((Bp, _LANE), f32),
        jax.ShapeDtypeStruct((Bp, Hp), f32),
        jax.ShapeDtypeStruct((Bp, Hp), f32),
    )
    scratch_shapes = [
        pltpu.VMEM((Bp, Hp), jnp.bfloat16),   # attended hidden, reused per vocab tile
        pltpu.VMEM((Bp, 1), f32),             # running max
        pltpu.VMEM((Bp, 1), f32),             # running sum-exp
    ]

    # VMEM budget (conservative: x2 buffering on everything) + explicit limit.
    def _nbytes(a):
        return int(a.size) * jnp.dtype(a.dtype).itemsize
    inv_bytes = sum(_nbytes(a) for a in inputs[:12])
    tiled_in_bytes = Hp * tile_v * 2 + tile_v * 4
    out_bytes = Bp * tile_v * 4 + Bp * _LANE * 4 + 2 * Bp * Hp * 4
    scratch_bytes = Bp * Hp * 2 + 2 * Bp * 4
    vmem_needed = 2 * (inv_bytes + tiled_in_bytes + out_bytes) + scratch_bytes
    vmem_limit = int(min(64 << 20, max(32 << 20, vmem_needed + (4 << 20))))

    flops = int(2 * Bp * Cp * 4 * Hp          # x @ W_ih
                + 2 * Bp * Hp * 4 * Hp        # h @ W_hh
                + 2 * Bp * Sp * Hp            # attention scores
                + 2 * Bp * Sp * Hp            # context
                + 4 * Bp * Hp * Hp            # concat layer (2 matmuls)
                + 2 * Bp * Hp * Vp)           # output projection
    transcendentals = int(Bp * (6 * Hp + Sp + Vp))
    bytes_accessed = int(sum(_nbytes(a) for a in inputs)
                         + Bp * Vp * 4 + Bp * _LANE * 4 + 2 * Bp * Hp * 4)

    logits_p, lse_p, h_new_p, c_new_p = pl.pallas_call(
        _decode_step_kernel,
        out_shape=out_shapes,
        grid=(n_vt,),
        in_specs=in_specs,
        out_specs=out_specs,
        scratch_shapes=scratch_shapes,
        compiler_params=pltpu.CompilerParams(
            dimension_semantics=("arbitrary",),     # sequential: online logsumexp
            vmem_limit_bytes=vmem_limit),
        cost_estimate=pl.CostEstimate(flops=flops,
                                      transcendentals=transcendentals,
                                      bytes_accessed=bytes_accessed),
    )(*inputs)

    # log-softmax finalization: one elementwise subtract in the wrapper.
    logp = logits_p[:B, :V] - lse_p[:B, :1]
    h_new = h_new_p[:B, :H]
    c_new = c_new_p[:B, :H]
    return logp, (h_new[None], c_new[None])


def init_params(key, vocab_size, char_dim, hidden_size, pad_idx, bos_idx):
    ks = jax.random.split(key, 8)
    scale = 0.1
    H, C, V = hidden_size, char_dim, vocab_size
    emb = scale * jax.random.normal(ks[0], (V, C), jnp.float32)
    emb = emb.at[pad_idx].set(0.0)  # padding_idx row is zero
    # LSTM weights stored as (in, out); biases combined (b_ih + b_hh)
    w_ih = scale * jax.random.normal(ks[1], (C, 4 * H), jnp.float32)
    w_hh = scale * jax.random.normal(ks[2], (H, 4 * H), jnp.float32)
    b_gates = scale * jax.random.normal(ks[3], (1, 4 * H), jnp.float32)
    w_cat = scale * jax.random.normal(ks[4], (2 * H, H), jnp.float32)
    b_cat = scale * jax.random.normal(ks[5], (1, H), jnp.float32)
    w_out = scale * jax.random.normal(ks[6], (H, V), jnp.float32)
    b_out = scale * jax.random.normal(ks[7], (1, V), jnp.float32)
    omask = jnp.ones((1, V), jnp.float32)
    omask = omask.at[0, pad_idx].set(0.0).at[0, bos_idx].set(0.0)
    return dict(embedding=emb, w_ih=w_ih, w_hh=w_hh, b_gates=b_gates,
                w_cat=w_cat, b_cat=b_cat, w_out=w_out, b_out=b_out,
                output_mask=omask)


if __name__ == "__main__":
    # Small, module-consistent shapes:
    #   encoder.hidden_size=16, bidirectional=True  -> decoder hidden H = 32
    B, S = 2, 8
    ENC_HIDDEN = 16
    H = 2 * ENC_HIDDEN           # 32
    CHAR_DIM = 16
    VOCAB = 32
    PAD_IDX, BOS_IDX = 0, 1

    key = jax.random.PRNGKey(0)
    k_par, k_in, k_h, k_c, k_enc = jax.random.split(key, 5)

    params = init_params(k_par, VOCAB, CHAR_DIM, H, PAD_IDX, BOS_IDX)
    padded = pad_params(params)

    input_ = jax.random.randint(k_in, (B,), 2, VOCAB, dtype=jnp.int32)
    h0 = 0.1 * jax.random.normal(k_h, (1, B, H), jnp.float32)
    c0 = 0.1 * jax.random.normal(k_c, (1, B, H), jnp.float32)
    encoder_hidden_states = 0.1 * jax.random.normal(k_enc, (B, S, H), jnp.float32)
    encoder_lens = jnp.array([S, S // 2], dtype=jnp.int32)

    # Per-sequence prep done ONCE, outside the decode loop.
    enc_prep = prepare_encoder(encoder_hidden_states, encoder_lens, padded)

    # Two decode steps (state fed back) to mimic an autoregressive loop.
    state = (h0, c0)
    log_probs = None
    for _ in range(2):
        log_probs, state = char_decoding_step(input_, state, enc_prep, padded)
        input_ = jnp.argmax(log_probs, axis=-1).astype(jnp.int32)
    jax.block_until_ready((log_probs, state))

    h_new, c_new = state
    assert log_probs.shape == (B, VOCAB)
    assert h_new.shape == (1, B, H) and c_new.shape == (1, B, H)
    assert bool(jnp.all(jnp.isfinite(log_probs)))
    # log-softmax sanity: probabilities sum to 1 per row
    assert bool(jnp.allclose(jnp.sum(jnp.exp(log_probs), axis=-1), 1.0, atol=1e-3))
    print("KERNEL_OK")
</pallas_src>

<mosaic_0001>
module attributes {stable_mosaic.version = 11 : i64} {
  func.func @_decode_step_kernel(%arg0: i32, %arg1: memref<8x128xf32, #tpu.memory_space<vmem>>, %arg2: memref<8x128xf32, #tpu.memory_space<vmem>>, %arg3: memref<8x128xf32, #tpu.memory_space<vmem>>, %arg4: memref<8x1x8xf32, #tpu.memory_space<vmem>>, %arg5: memref<8x8x128xbf16, #tpu.memory_space<vmem>>, %arg6: memref<8x128x8xbf16, #tpu.memory_space<vmem>>, %arg7: memref<128x512xbf16, #tpu.memory_space<vmem>>, %arg8: memref<128x512xbf16, #tpu.memory_space<vmem>>, %arg9: memref<1x512xf32, #tpu.memory_space<vmem>>, %arg10: memref<128x128xbf16, #tpu.memory_space<vmem>>, %arg11: memref<128x128xbf16, #tpu.memory_space<vmem>>, %arg12: memref<1x128xf32, #tpu.memory_space<vmem>>, %arg13: memref<128x128xbf16, #tpu.memory_space<vmem>>, %arg14: memref<1x128xf32, #tpu.memory_space<vmem>>, %arg15: memref<8x128xf32, #tpu.memory_space<vmem>>, %arg16: memref<8x128xf32, #tpu.memory_space<vmem>>, %arg17: memref<8x128xf32, #tpu.memory_space<vmem>>, %arg18: memref<8x128xf32, #tpu.memory_space<vmem>>, %arg19: memref<8x128xbf16, #tpu.memory_space<vmem>>, %arg20: memref<8x1xf32, #tpu.memory_space<vmem>>, %arg21: memref<8x1xf32, #tpu.memory_space<vmem>>) attributes {dimension_semantics = [#tpu.dimension_semantics<arbitrary>], iteration_bounds = array<i64: 1>, scalar_prefetch = 0 : i64, scratch_operands = 3 : i64, tpu.core_type = #tpu.core_type<tc>, window_params = [{pipeline_mode = #tpu.pipeline_mode<synchronous>, transform_indices = @transform_0, window_bounds = array<i64: 8, 128>}, {pipeline_mode = #tpu.pipeline_mode<synchronous>, transform_indices = @transform_1, window_bounds = array<i64: 8, 128>}, {pipeline_mode = #tpu.pipeline_mode<synchronous>, transform_indices = @transform_2, window_bounds = array<i64: 8, 128>}, {pipeline_mode = #tpu.pipeline_mode<synchronous>, transform_indices = @transform_3, window_bounds = array<i64: 8, 1, 8>}, {pipeline_mode = #tpu.pipeline_mode<synchronous>, transform_indices = @transform_4, window_bounds = array<i64: 8, 8, 128>}, {pipeline_mode = #tpu.pipeline_mode<synchronous>, transform_indices = @transform_5, window_bounds = array<i64: 8, 128, 8>}, {pipeline_mode = #tpu.pipeline_mode<synchronous>, transform_indices = @transform_6, window_bounds = array<i64: 128, 512>}, {pipeline_mode = #tpu.pipeline_mode<synchronous>, transform_indices = @transform_7, window_bounds = array<i64: 128, 512>}, {pipeline_mode = #tpu.pipeline_mode<synchronous>, transform_indices = @transform_8, window_bounds = array<i64: 1, 512>}, {pipeline_mode = #tpu.pipeline_mode<synchronous>, transform_indices = @transform_9, window_bounds = array<i64: 128, 128>}, {pipeline_mode = #tpu.pipeline_mode<synchronous>, transform_indices = @transform_10, window_bounds = array<i64: 128, 128>}, {pipeline_mode = #tpu.pipeline_mode<synchronous>, transform_indices = @transform_11, window_bounds = array<i64: 1, 128>}, {transform_indices = @transform_12, window_bounds = array<i64: 128, 128>}, {transform_indices = @transform_13, window_bounds = array<i64: 1, 128>}, {transform_indices = @transform_14, window_bounds = array<i64: 8, 128>}, {pipeline_mode = #tpu.pipeline_mode<synchronous>, transform_indices = @transform_15, window_bounds = array<i64: 8, 128>}, {pipeline_mode = #tpu.pipeline_mode<synchronous>, transform_indices = @transform_16, window_bounds = array<i64: 8, 128>}, {pipeline_mode = #tpu.pipeline_mode<synchronous>, transform_indices = @transform_17, window_bounds = array<i64: 8, 128>}]} {
    %c0_i32 = arith.constant 0 : i32
    %0 = arith.cmpi eq, %arg0, %c0_i32 : i32
    %1 = arith.extui %0 : i1 to i32
    %c0_i32_0 = arith.constant 0 : i32
    %2 = arith.cmpi ne, %1, %c0_i32_0 : i32
    scf.if %2 {
      %c0_20 = arith.constant 0 : index
      %c0_21 = arith.constant 0 : index
      %29 = vector.load %arg1[%c0_20, %c0_21] : memref<8x128xf32, #tpu.memory_space<vmem>>, vector<8x128xf32>
      %30 = arith.truncf %29 : vector<8x128xf32> to vector<8x128xbf16>
      %c0_22 = arith.constant 0 : index
      %c0_23 = arith.constant 0 : index
      %31 = vector.load %arg2[%c0_22, %c0_23] : memref<8x128xf32, #tpu.memory_space<vmem>>, vector<8x128xf32>
      %c0_24 = arith.constant 0 : index
      %c0_25 = arith.constant 0 : index
      %32 = vector.load %arg3[%c0_24, %c0_25] : memref<8x128xf32, #tpu.memory_space<vmem>>, vector<8x128xf32>
      %c0_26 = arith.constant 0 : index
      %c0_27 = arith.constant 0 : index
      %33 = vector.load %arg7[%c0_26, %c0_27] : memref<128x512xbf16, #tpu.memory_space<vmem>>, vector<128x512xbf16>
      %cst_28 = arith.constant dense<0.000000e+00> : vector<8x512xf32>
      %34 = tpu.matmul %30, %33, %cst_28 {dimension_numbers = #tpu.dot_dimension_numbers<[1], [0], [0], [1], [0, 0, 1, 1], [], []>} : vector<8x128xbf16>, vector<128x512xbf16>, vector<8x512xf32> -> vector<8x512xf32>
      %35 = arith.truncf %31 : vector<8x128xf32> to vector<8x128xbf16>
      %c0_29 = arith.constant 0 : index
      %c0_30 = arith.constant 0 : index
      %36 = vector.load %arg8[%c0_29, %c0_30] : memref<128x512xbf16, #tpu.memory_space<vmem>>, vector<128x512xbf16>
      %cst_31 = arith.constant dense<0.000000e+00> : vector<8x512xf32>
      %37 = tpu.matmul %35, %36, %cst_31 {dimension_numbers = #tpu.dot_dimension_numbers<[1], [0], [0], [1], [0, 0, 1, 1], [], []>} : vector<8x128xbf16>, vector<128x512xbf16>, vector<8x512xf32> -> vector<8x512xf32>
      %38 = arith.addf %34, %37 : vector<8x512xf32>
      %c0_32 = arith.constant 0 : index
      %c0_33 = arith.constant 0 : index
      %39 = vector.load %arg9[%c0_32, %c0_33] : memref<1x512xf32, #tpu.memory_space<vmem>>, vector<1x512xf32>
      %40 = vector.broadcast %39 : vector<1x512xf32> to vector<8x512xf32>
      %41 = arith.addf %38, %40 : vector<8x512xf32>
      %42 = vector.extract_strided_slice %41 {offsets = [0, 0], sizes = [8, 128], strides = [1, 1]} : vector<8x512xf32> to vector<8x128xf32>
      %43 = arith.negf %42 : vector<8x128xf32>
      %44 = math.exp %43 : vector<8x128xf32>
      %cst_34 = arith.constant 1.000000e+00 : f32
      %45 = vector.broadcast %cst_34 : f32 to vector<8x128xf32>
      %46 = arith.addf %45, %44 : vector<8x128xf32>
      %47 = arith.divf %45, %46 : vector<8x128xf32>
      %48 = vector.extract_strided_slice %41 {offsets = [0, 128], sizes = [8, 128], strides = [1, 1]} : vector<8x512xf32> to vector<8x128xf32>
      %49 = arith.negf %48 : vector<8x128xf32>
      %50 = math.exp %49 : vector<8x128xf32>
      %cst_35 = arith.constant 1.000000e+00 : f32
      %51 = vector.broadcast %cst_35 : f32 to vector<8x128xf32>
      %52 = arith.addf %51, %50 : vector<8x128xf32>
      %53 = arith.divf %51, %52 : vector<8x128xf32>
      %54 = vector.extract_strided_slice %41 {offsets = [0, 256], sizes = [8, 128], strides = [1, 1]} : vector<8x512xf32> to vector<8x128xf32>
      %55 = math.tanh %54 : vector<8x128xf32>
      %56 = vector.extract_strided_slice %41 {offsets = [0, 384], sizes = [8, 128], strides = [1, 1]} : vector<8x512xf32> to vector<8x128xf32>
      %57 = arith.negf %56 : vector<8x128xf32>
      %58 = math.exp %57 : vector<8x128xf32>
      %cst_36 = arith.constant 1.000000e+00 : f32
      %59 = vector.broadcast %cst_36 : f32 to vector<8x128xf32>
      %60 = arith.addf %59, %58 : vector<8x128xf32>
      %61 = arith.divf %59, %60 : vector<8x128xf32>
      %62 = arith.mulf %53, %32 : vector<8x128xf32>
      %63 = arith.mulf %47, %55 : vector<8x128xf32>
      %64 = arith.addf %62, %63 : vector<8x128xf32>
      %65 = math.tanh %64 : vector<8x128xf32>
      %66 = arith.mulf %61, %65 : vector<8x128xf32>
      %c0_37 = arith.constant 0 : index
      %c0_38 = arith.constant 0 : index
      %67 = vector.load %arg17[%c0_37, %c0_38] : memref<8x128xf32, #tpu.memory_space<vmem>>, vector<8x128xf32>
      tpu.vector_store %arg17[%c0_37, %c0_38], %66 {strides = array<i32>} : memref<8x128xf32, #tpu.memory_space<vmem>>, vector<8x128xf32>,
      %c0_39 = arith.constant 0 : index
      %c0_40 = arith.constant 0 : index
      %68 = vector.load %arg18[%c0_39, %c0_40] : memref<8x128xf32, #tpu.memory_space<vmem>>, vector<8x128xf32>
      tpu.vector_store %arg18[%c0_39, %c0_40], %64 {strides = array<i32>} : memref<8x128xf32, #tpu.memory_space<vmem>>, vector<8x128xf32>,
      %c0_41 = arith.constant 0 : index
      %c0_42 = arith.constant 0 : index
      %c0_43 = arith.constant 0 : index
      %69 = vector.load %arg4[%c0_41, %c0_42, %c0_43] : memref<8x1x8xf32, #tpu.memory_space<vmem>>, vector<8x1x8xf32>
      %70 = vector.shape_cast %66 : vector<8x128xf32> to vector<8x1x128xf32>
      %71 = arith.truncf %70 : vector<8x1x128xf32> to vector<8x1x128xbf16>
      %c0_44 = arith.constant 0 : index
      %c0_45 = arith.constant 0 : index
      %c0_46 = arith.constant 0 : index
      %72 = vector.load %arg6[%c0_44, %c0_45, %c0_46] : memref<8x128x8xbf16, #tpu.memory_space<vmem>>, vector<8x128x8xbf16>
      "tpu.trace_start"() <{level = 10 : i32, message = "bqh,bhs->bqs"}> : () -> ()
      %cst_47 = arith.constant dense<0.000000e+00> : vector<8x1x8xf32>
      %73 = tpu.matmul %71, %72, %cst_47 {dimension_numbers = #tpu.dot_dimension_numbers<[2], [1], [1], [2], [0, 0, 0, 1, 1, 2], [0], [0]>} : vector<8x1x128xbf16>, vector<8x128x8xbf16>, vector<8x1x8xf32> -> vector<8x1x8xf32>
      "tpu.trace_stop"() : () -> ()
      %74 = arith.mulf %73, %69 : vector<8x1x8xf32>
      %cst_48 = arith.constant dense<0xFF800000> : vector<8x1xf32>
      %75 = vector.multi_reduction <maximumf>, %74, %cst_48 [2] : vector<8x1x8xf32> to vector<8x1xf32>
      %76 = vector.shape_cast %75 : vector<8x1xf32> to vector<8x1x1xf32>
      %77 = vector.broadcast %76 : vector<8x1x1xf32> to vector<8x1x8xf32>
      %78 = arith.subf %74, %77 : vector<8x1x8xf32>
      %79 = math.exp %78 : vector<8x1x8xf32>
      %80 = arith.mulf %79, %69 : vector<8x1x8xf32>
      %cst_49 = arith.constant dense<0.000000e+00> : vector<8x1xf32>
      %81 = vector.multi_reduction <add>, %80, %cst_49 [2] : vector<8x1x8xf32> to vector<8x1xf32>
      %82 = vector.shape_cast %81 : vector<8x1xf32> to vector<8x1x1xf32>
      %cst_50 = arith.constant 9.99999982E-14 : f32
      %83 = vector.broadcast %cst_50 : f32 to vector<8x1x1xf32>
      %84 = arith.addf %82, %83 : vector<8x1x1xf32>
      %85 = vector.broadcast %84 : vector<8x1x1xf32> to vector<8x1x8xf32>
      %86 = arith.divf %80, %85 : vector<8x1x8xf32>
      %87 = arith.truncf %86 : vector<8x1x8xf32> to vector<8x1x8xbf16>
      %c0_51 = arith.constant 0 : index
      %c0_52 = arith.constant 0 : index
      %c0_53 = arith.constant 0 : index
      %88 = vector.load %arg5[%c0_51, %c0_52, %c0_53] : memref<8x8x128xbf16, #tpu.memory_space<vmem>>, vector<8x8x128xbf16>
      "tpu.trace_start"() <{level = 10 : i32, message = "bqs,bsh->bqh"}> : () -> ()
      %cst_54 = arith.constant dense<0.000000e+00> : vector<8x1x128xf32>
      %89 = tpu.matmul %87, %88, %cst_54 {dimension_numbers = #tpu.dot_dimension_numbers<[2], [1], [1], [2], [0, 0, 0, 1, 1, 2], [0], [0]>} : vector<8x1x8xbf16>, vector<8x8x128xbf16>, vector<8x1x128xf32> -> vector<8x1x128xf32>
      "tpu.trace_stop"() : () -> ()
      %90 = vector.shape_cast %89 : vector<8x1x128xf32> to vector<8x128xf32>
      %91 = arith.truncf %90 : vector<8x128xf32> to vector<8x128xbf16>
      %c0_55 = arith.constant 0 : index
      %c0_56 = arith.constant 0 : index
      %92 = vector.load %arg10[%c0_55, %c0_56] : memref<128x128xbf16, #tpu.memory_space<vmem>>, vector<128x128xbf16>
      %cst_57 = arith.constant dense<0.000000e+00> : vector<8x128xf32>
      %93 = tpu.matmul %91, %92, %cst_57 {dimension_numbers = #tpu.dot_dimension_numbers<[1], [0], [0], [1], [0, 0, 1, 1], [], []>} : vector<8x128xbf16>, vector<128x128xbf16>, vector<8x128xf32> -> vector<8x128xf32>
      %94 = arith.truncf %66 : vector<8x128xf32> to vector<8x128xbf16>
      %c0_58 = arith.constant 0 : index
      %c0_59 = arith.constant 0 : index
      %95 = vector.load %arg11[%c0_58, %c0_59] : memref<128x128xbf16, #tpu.memory_space<vmem>>, vector<128x128xbf16>
      %cst_60 = arith.constant dense<0.000000e+00> : vector<8x128xf32>
      %96 = tpu.matmul %94, %95, %cst_60 {dimension_numbers = #tpu.dot_dimension_numbers<[1], [0], [0], [1], [0, 0, 1, 1], [], []>} : vector<8x128xbf16>, vector<128x128xbf16>, vector<8x128xf32> -> vector<8x128xf32>
      %97 = arith.addf %93, %96 : vector<8x128xf32>
      %c0_61 = arith.constant 0 : index
      %c0_62 = arith.constant 0 : index
      %98 = vector.load %arg12[%c0_61, %c0_62] : memref<1x128xf32, #tpu.memory_space<vmem>>, vector<1x128xf32>
      %99 = vector.broadcast %98 : vector<1x128xf32> to vector<8x128xf32>
      %100 = arith.addf %97, %99 : vector<8x128xf32>
      %101 = math.tanh %100 : vector<8x128xf32>
      %102 = arith.truncf %101 : vector<8x128xf32> to vector<8x128xbf16>
      %c0_63 = arith.constant 0 : index
      %c0_64 = arith.constant 0 : index
      %103 = vector.load %arg19[%c0_63, %c0_64] : memref<8x128xbf16, #tpu.memory_space<vmem>>, vector<8x128xbf16>
      tpu.vector_store %arg19[%c0_63, %c0_64], %102 {strides = array<i32>} : memref<8x128xbf16, #tpu.memory_space<vmem>>, vector<8x128xbf16>,
      %cst_65 = arith.constant 0xFF800000 : f32
      %104 = vector.broadcast %cst_65 : f32 to vector<8x1xf32>
      %c0_66 = arith.constant 0 : index
      %c0_67 = arith.constant 0 : index
      %105 = vector.load %arg20[%c0_66, %c0_67] : memref<8x1xf32, #tpu.memory_space<vmem>>, vector<8x1xf32>
      tpu.vector_store %arg20[%c0_66, %c0_67], %104 {strides = array<i32>} : memref<8x1xf32, #tpu.memory_space<vmem>>, vector<8x1xf32>,
      %cst_68 = arith.constant 0.000000e+00 : f32
      %106 = vector.broadcast %cst_68 : f32 to vector<8x1xf32>
      %c0_69 = arith.constant 0 : index
      %c0_70 = arith.constant 0 : index
      %107 = vector.load %arg21[%c0_69, %c0_70] : memref<8x1xf32, #tpu.memory_space<vmem>>, vector<8x1xf32>
      tpu.vector_store %arg21[%c0_69, %c0_70], %106 {strides = array<i32>} : memref<8x1xf32, #tpu.memory_space<vmem>>, vector<8x1xf32>,
    } else {
    }
    %c0 = arith.constant 0 : index
    %c0_1 = arith.constant 0 : index
    %3 = vector.load %arg19[%c0, %c0_1] : memref<8x128xbf16, #tpu.memory_space<vmem>>, vector<8x128xbf16>
    %c0_2 = arith.constant 0 : index
    %c0_3 = arith.constant 0 : index
    %4 = vector.load %arg13[%c0_2, %c0_3] : memref<128x128xbf16, #tpu.memory_space<vmem>>, vector<128x128xbf16>
    %cst = arith.constant dense<0.000000e+00> : vector<8x128xf32>
    %5 = tpu.matmul %3, %4, %cst {dimension_numbers = #tpu.dot_dimension_numbers<[1], [0], [0], [1], [0, 0, 1, 1], [], []>} : vector<8x128xbf16>, vector<128x128xbf16>, vector<8x128xf32> -> vector<8x128xf32>
    %c0_4 = arith.constant 0 : index
    %c0_5 = arith.constant 0 : index
    %6 = vector.load %arg14[%c0_4, %c0_5] : memref<1x128xf32, #tpu.memory_space<vmem>>, vector<1x128xf32>
    %7 = vector.broadcast %6 : vector<1x128xf32> to vector<8x128xf32>
    %8 = arith.addf %5, %7 : vector<8x128xf32>
    %c0_6 = arith.constant 0 : index
    %c0_7 = arith.constant 0 : index
    %9 = vector.load %arg15[%c0_6, %c0_7] : memref<8x128xf32, #tpu.memory_space<vmem>>, vector<8x128xf32>
    tpu.vector_store %arg15[%c0_6, %c0_7], %8 {strides = array<i32>} : memref<8x128xf32, #tpu.memory_space<vmem>>, vector<8x128xf32>,
    %cst_8 = arith.constant dense<0xFF800000> : vector<8xf32>
    %10 = vector.multi_reduction <maximumf>, %8, %cst_8 [1] : vector<8x128xf32> to vector<8xf32>
    %11 = vector.shape_cast %10 : vector<8xf32> to vector<8x1xf32>
    %c0_9 = arith.constant 0 : index
    %c0_10 = arith.constant 0 : index
    %12 = vector.load %arg20[%c0_9, %c0_10] : memref<8x1xf32, #tpu.memory_space<vmem>>, vector<8x1xf32>
    %13 = arith.maximumf %12, %11 : vector<8x1xf32>
    %c0_11 = arith.constant 0 : index
    %c0_12 = arith.constant 0 : index
    %14 = vector.load %arg21[%c0_11, %c0_12] : memref<8x1xf32, #tpu.memory_space<vmem>>, vector<8x1xf32>
    %15 = arith.subf %12, %13 : vector<8x1xf32>
    %16 = math.exp %15 : vector<8x1xf32>
    %17 = arith.mulf %14, %16 : vector<8x1xf32>
    %18 = vector.broadcast %13 : vector<8x1xf32> to vector<8x128xf32>
    %19 = arith.subf %8, %18 : vector<8x128xf32>
    %20 = math.exp %19 : vector<8x128xf32>
    %cst_13 = arith.constant dense<0.000000e+00> : vector<8xf32>
    %21 = vector.multi_reduction <add>, %20, %cst_13 [1] : vector<8x128xf32> to vector<8xf32>
    %22 = vector.shape_cast %21 : vector<8xf32> to vector<8x1xf32>
    %23 = arith.addf %17, %22 : vector<8x1xf32>
    %c0_14 = arith.constant 0 : index
    %c0_15 = arith.constant 0 : index
    %24 = vector.load %arg21[%c0_14, %c0_15] : memref<8x1xf32, #tpu.memory_space<vmem>>, vector<8x1xf32>
    tpu.vector_store %arg21[%c0_14, %c0_15], %23 {strides = array<i32>} : memref<8x1xf32, #tpu.memory_space<vmem>>, vector<8x1xf32>,
    %c0_16 = arith.constant 0 : index
    %c0_17 = arith.constant 0 : index
    %25 = vector.load %arg20[%c0_16, %c0_17] : memref<8x1xf32, #tpu.memory_space<vmem>>, vector<8x1xf32>
    tpu.vector_store %arg20[%c0_16, %c0_17], %13 {strides = array<i32>} : memref<8x1xf32, #tpu.memory_space<vmem>>, vector<8x1xf32>,
    %c0_i32_18 = arith.constant 0 : i32
    %26 = arith.cmpi eq, %arg0, %c0_i32_18 : i32
    %27 = arith.extui %26 : i1 to i32
    %c0_i32_19 = arith.constant 0 : i32
    %28 = arith.cmpi ne, %27, %c0_i32_19 : i32
    scf.if %28 {
      %c0_20 = arith.constant 0 : index
      %c0_21 = arith.constant 0 : index
      %29 = vector.load %arg20[%c0_20, %c0_21] : memref<8x1xf32, #tpu.memory_space<vmem>>, vector<8x1xf32>
      %c0_22 = arith.constant 0 : index
      %c0_23 = arith.constant 0 : index
      %30 = vector.load %arg21[%c0_22, %c0_23] : memref<8x1xf32, #tpu.memory_space<vmem>>, vector<8x1xf32>
      %31 = math.log %30 : vector<8x1xf32>
      %32 = arith.addf %29, %31 : vector<8x1xf32>
      %33 = vector.shape_cast %32 : vector<8x1xf32> to vector<8x1xf32>
      %34 = vector.broadcast %33 : vector<8x1xf32> to vector<8x128xf32>
      %c0_24 = arith.constant 0 : index
      %c0_25 = arith.constant 0 : index
      %35 = vector.load %arg16[%c0_24, %c0_25] : memref<8x128xf32, #tpu.memory_space<vmem>>, vector<8x128xf32>
      tpu.vector_store %arg16[%c0_24, %c0_25], %34 {strides = array<i32>} : memref<8x128xf32, #tpu.memory_space<vmem>>, vector<8x128xf32>,
    } else {
    }
    return
  }
  func.func @transform_0(%arg0: i32) -> (i32, i32) {
    %c0_i32 = arith.constant 0 : i32
    %c0_i32_0 = arith.constant 0 : i32
    %c0_i32_1 = arith.constant 0 : i32
    return %c0_i32, %c0_i32_0 : i32, i32
  }
  func.func @transform_1(%arg0: i32) -> (i32, i32) {
    %c0_i32 = arith.constant 0 : i32
    %c0_i32_0 = arith.constant 0 : i32
    %c0_i32_1 = arith.constant 0 : i32
    return %c0_i32, %c0_i32_0 : i32, i32
  }
  func.func @transform_2(%arg0: i32) -> (i32, i32) {
    %c0_i32 = arith.constant 0 : i32
    %c0_i32_0 = arith.constant 0 : i32
    %c0_i32_1 = arith.constant 0 : i32
    return %c0_i32, %c0_i32_0 : i32, i32
  }
  func.func @transform_3(%arg0: i32) -> (i32, i32, i32) {
    %c0_i32 = arith.constant 0 : i32
    %c0_i32_0 = arith.constant 0 : i32
    %c0_i32_1 = arith.constant 0 : i32
    %c0_i32_2 = arith.constant 0 : i32
    return %c0_i32, %c0_i32_0, %c0_i32_1 : i32, i32, i32
  }
  func.func @transform_4(%arg0: i32) -> (i32, i32, i32) {
    %c0_i32 = arith.constant 0 : i32
    %c0_i32_0 = arith.constant 0 : i32
    %c0_i32_1 = arith.constant 0 : i32
    %c0_i32_2 = arith.constant 0 : i32
    return %c0_i32, %c0_i32_0, %c0_i32_1 : i32, i32, i32
  }
  func.func @transform_5(%arg0: i32) -> (i32, i32, i32) {
    %c0_i32 = arith.constant 0 : i32
    %c0_i32_0 = arith.constant 0 : i32
    %c0_i32_1 = arith.constant 0 : i32
    %c0_i32_2 = arith.constant 0 : i32
    return %c0_i32, %c0_i32_0, %c0_i32_1 : i32, i32, i32
  }
  func.func @transform_6(%arg0: i32) -> (i32, i32) {
    %c0_i32 = arith.constant 0 : i32
    %c0_i32_0 = arith.constant 0 : i32
    %c0_i32_1 = arith.constant 0 : i32
    return %c0_i32, %c0_i32_0 : i32, i32
  }
  func.func @transform_7(%arg0: i32) -> (i32, i32) {
    %c0_i32 = arith.constant 0 : i32
    %c0_i32_0 = arith.constant 0 : i32
    %c0_i32_1 = arith.constant 0 : i32
    return %c0_i32, %c0_i32_0 : i32, i32
  }
  func.func @transform_8(%arg0: i32) -> (i32, i32) {
    %c0_i32 = arith.constant 0 : i32
    %c0_i32_0 = arith.constant 0 : i32
    %c0_i32_1 = arith.constant 0 : i32
    return %c0_i32, %c0_i32_0 : i32, i32
  }
  func.func @transform_9(%arg0: i32) -> (i32, i32) {
    %c0_i32 = arith.constant 0 : i32
    %c0_i32_0 = arith.constant 0 : i32
    %c0_i32_1 = arith.constant 0 : i32
    return %c0_i32, %c0_i32_0 : i32, i32
  }
  func.func @transform_10(%arg0: i32) -> (i32, i32) {
    %c0_i32 = arith.constant 0 : i32
    %c0_i32_0 = arith.constant 0 : i32
    %c0_i32_1 = arith.constant 0 : i32
    return %c0_i32, %c0_i32_0 : i32, i32
  }
  func.func @transform_11(%arg0: i32) -> (i32, i32) {
    %c0_i32 = arith.constant 0 : i32
    %c0_i32_0 = arith.constant 0 : i32
    %c0_i32_1 = arith.constant 0 : i32
    return %c0_i32, %c0_i32_0 : i32, i32
  }
  func.func @transform_12(%arg0: i32) -> (i32, i32) {
    %c0_i32 = arith.constant 0 : i32
    %c0_i32_0 = arith.constant 0 : i32
    return %c0_i32, %arg0 : i32, i32
  }
  func.func @transform_13(%arg0: i32) -> (i32, i32) {
    %c0_i32 = arith.constant 0 : i32
    %c0_i32_0 = arith.constant 0 : i32
    return %c0_i32, %arg0 : i32, i32
  }
  func.func @transform_14(%arg0: i32) -> (i32, i32) {
    %c0_i32 = arith.constant 0 : i32
    %c0_i32_0 = arith.constant 0 : i32
    return %c0_i32, %arg0 : i32, i32
  }
  func.func @transform_15(%arg0: i32) -> (i32, i32) {
    %c0_i32 = arith.constant 0 : i32
    %c0_i32_0 = arith.constant 0 : i32
    %c0_i32_1 = arith.constant 0 : i32
    return %c0_i32, %c0_i32_0 : i32, i32
  }
  func.func @transform_16(%arg0: i32) -> (i32, i32) {
    %c0_i32 = arith.constant 0 : i32
    %c0_i32_0 = arith.constant 0 : i32
    %c0_i32_1 = arith.constant 0 : i32
    return %c0_i32, %c0_i32_0 : i32, i32
  }
  func.func @transform_17(%arg0: i32) -> (i32, i32) {
    %c0_i32 = arith.constant 0 : i32
    %c0_i32_0 = arith.constant 0 : i32
    %c0_i32_1 = arith.constant 0 : i32
    return %c0_i32, %c0_i32_0 : i32, i32
  }
}

</mosaic_0001>

<bundles_post_ra>
// kernel: tpu_custom_call.1
= control target key start
LH: loop header
LB: loop body
LE: loop exit
PB: predicated region body
PF: predicated region fallthrough
CT: control target
= control target key end

     0   :  { %s4539_s0 = inlined_call_operand.hbm [shape: f32[8,128], index: 0, kind: input, shape index: {}]   ;;  %s4540_s1 = inlined_call_operand.hbm [shape: f32[8,128], index: 1, kind: input, shape index: {}]   ;;  %s4541_s2 = inlined_call_operand.hbm [shape: f32[8,128], index: 2, kind: input, shape index: {}]   ;;  %s4542_s3 = inlined_call_operand.hbm [shape: f32[8,1,8], index: 3, kind: input, shape index: {}]   ;;  %s4543_s4 = inlined_call_operand.vmem [shape: bf16[8,8,128], index: 4, kind: input, shape index: {}]   ;;  %s4544_s5 = inlined_call_operand.vmem [shape: bf16[8,128,8], index: 5, kind: input, shape index: {}]   ;;  %s4545_s6 = inlined_call_operand.vmem [shape: bf16[128,512], index: 6, kind: input, shape index: {}]   ;;  %s4546_s7 = inlined_call_operand.vmem [shape: bf16[128,512], index: 7, kind: input, shape index: {}]   ;;  %s4547_s8 = inlined_call_operand.vmem [shape: f32[1,512], index: 8, kind: input, shape index: {}]   ;;  %s4548_s9 = inlined_call_operand.hbm [shape: bf16[128,128], index: 9, kind: input, shape index: {}]   ;;  %s4549_s10 = inlined_call_operand.hbm [shape: bf16[128,128], index: 10, kind: input, shape index: {}]   ;;  %s4550_s11 = inlined_call_operand.vmem [shape: f32[1,128], index: 11, kind: input, shape index: {}]   ;;  %s4551_s12 = inlined_call_operand.hbm [shape: bf16[128,128], index: 12, kind: input, shape index: {}]   ;;  %s4552_s13 = inlined_call_operand.vmem [shape: f32[1,128], index: 13, kind: input, shape index: {}]   ;;  %s4553_s14 = inlined_call_operand.hbm [shape: f32[8,128], index: 14, kind: output, shape index: {0}]   ;;  %s4554_s15 = inlined_call_operand.hbm [shape: f32[8,128], index: 15, kind: output, shape index: {1}]   ;;  %s4555_s16 = inlined_call_operand.hbm [shape: f32[8,128], index: 16, kind: output, shape index: {2}]   ;;  %s4556_s17 = inlined_call_operand.hbm [shape: f32[8,128], index: 17, kind: output, shape index: {3}]  }
   0x1   :  { %4557 = sst [smem:[#allocation30_spill]] %s4539_s0 }
   0x2   :  { %4558 = sst [smem:[#allocation31_spill]] %s4540_s1 }
   0x3   :  { %23 = vsyncpa [#allocation6], 0 }
   0x4   :  { %24 = vsyncpa [#allocation9], 0 }
   0x5   :  { %25 = vsyncpa [#allocation12], 0 }
   0x6   :  { %26 = vsyncpa [#allocation15], 0 }
   0x7   :  { %27 = vsyncpa [#allocation7], 0 }
   0x8   :  { %28 = vsyncpa [#allocation19], 0 }
   0x9   :  { %29 = vsyncpa [#allocation22], 0  ;;  %s3681_s24 = smov [#allocation8]   ;;  %s3682_s26 = smov [#allocation11]  }
   0xa   :  { %s46_s25 = sshll.u32 %s3681_s24, 4  ;;  %s65_s27 = sshll.u32 %s3682_s26, 4  ;;  %s47_s25 = int_to_ptr.vmem [resolvable:$true] %s46_s25  ;;  %s66_s27 = int_to_ptr.vmem [resolvable:$true] %s65_s27 }
   0xb   :  { %s3455_s28 = scalar_lea.vmem %s47_s25, 128  ;;  %p3460_p1 = scmp.lt.s32.totalorder %s47_s25, %s47_s25 }
   0xc   :  { %p3456_p0 = scmp.ne.s32.totalorder %s47_s25, %s3455_s28  ;;  %p3461_p2 = scmp.lt.s32.totalorder %s3455_s28, %s3455_s28 }
   0xe   :  { %p3462_p3 = por %p3461_p2, %p3460_p1 }
  0x10   :  { %p3463_p4 = pnand %p3462_p3, %p3456_p0 }
  0x12   :  { %3466 = shalt.err (!%p3463_p4)
}
  0x13   :  { %s4559_s30 = sld [smem:[#allocation31_spill]]  ;;  %s3475_s18 = scalar_lea.vmem %s66_s27, 128 }
  0x14   :  { %p3476_p5 = scmp.ne.s32.totalorder %s66_s27, %s3475_s18  ;;  %p3480_p6 = scmp.lt.s32.totalorder %s66_s27, %s66_s27 }
  0x15   :  { %p3481_p7 = scmp.lt.s32.totalorder %s3475_s18, %s3475_s18 }
  0x17   :  { %p3482_p8 = por %p3481_p7, %p3480_p6 }
  0x19   :  { %49 = dma.hbm_to_vmem [thread:$0]  %s4559_s30, 128, %s47_s25, [#allocation9]  }
  0x1a   :  { %p3483_p9 = pnand %p3482_p8, %p3476_p5 }
  0x1c   :  { %3486 = shalt.err (!%p3483_p9)
}
  0x1d   :  { %s3683_s19 = smov 16   ;;  %s3684_s1 = smov 1  }
  0x1e   :  { %71 = dma.hbm_to_vmem [thread:$0]  %s4542_s3, 128, %s66_s27, [#allocation12], %s3683_s19, %s3683_s19, %s3684_s1  }
  0x1f   :  { %s3685_s22 = smov [#allocation14]   ;;  %s3686_s24 = smov [#allocation5]  }
  0x20   :  { %s99_s23 = sshll.u32 %s3685_s22, 4  ;;  %s36_s26 = sshll.u32 %s3686_s24, 4  ;;  %s100_s23 = int_to_ptr.vmem [resolvable:$true] %s99_s23  ;;  %s37_s26 = int_to_ptr.vmem [resolvable:$true] %s36_s26 }
  0x21   :  { %s3495_s25 = scalar_lea.vmem %s100_s23, 1024  ;;  %p3500_p11 = scmp.lt.s32.totalorder %s100_s23, %s100_s23 }
  0x22   :  { %p3496_p10 = scmp.ne.s32.totalorder %s100_s23, %s3495_s25  ;;  %p3501_p12 = scmp.lt.s32.totalorder %s3495_s25, %s3495_s25 }
  0x24   :  { %p3502_p13 = por %p3501_p12, %p3500_p11 }
  0x26   :  { %p3503_p0 = pnand %p3502_p13, %p3496_p10 }
  0x28   :  { %3506 = shalt.err (!%p3503_p0)
}
  0x29   :  { %s3687_s28 = smov 64   ;;  %s3688_s29 = smov 4  }
  0x2a   :  { %105 = dma.hbm_to_vmem [thread:$0]  %s4549_s10, 1024, %s100_s23, [#allocation15], %s3687_s28, %s3687_s28, %s3688_s29  }
  0x2b   :  { %s3515_s27 = scalar_lea.vmem %s37_s26, 128  ;;  %p3520_p2 = scmp.lt.s32.totalorder %s37_s26, %s37_s26 }
  0x2c   :  { %p3516_p1 = scmp.ne.s32.totalorder %s37_s26, %s3515_s27  ;;  %p3521_p3 = scmp.lt.s32.totalorder %s3515_s27, %s3515_s27 }
  0x2e   :  { %p3522_p4 = por %p3521_p3, %p3520_p2 }
  0x30   :  { %p3523_p5 = pnand %p3522_p4, %p3516_p1 }
  0x32   :  { %3526 = shalt.err (!%p3523_p5)
}
  0x33   :  { %s4560_s19 = sld [smem:[#allocation30_spill]]  ;;  %s3689_s1 = smov [#allocation10]  }
  0x34   :  { %s56_s20 = sshll.u32 %s3689_s1, 4  ;;  %s3690_s21 = smov [#allocation13]   ;;  %s57_s20 = int_to_ptr.vmem [resolvable:$true] %s56_s20 }
  0x35   :  { %s87_s22 = sshll.u32 %s3690_s21, 4  ;;  %s3535_s24 = scalar_lea.vmem %s57_s20, 128  ;;  %s88_s22 = int_to_ptr.vmem [resolvable:$true] %s87_s22 }
  0x36   :  { %p3536_p6 = scmp.ne.s32.totalorder %s57_s20, %s3535_s24  ;;  %p3540_p7 = scmp.lt.s32.totalorder %s57_s20, %s57_s20 }
  0x37   :  { %p3541_p8 = scmp.lt.s32.totalorder %s3535_s24, %s3535_s24 }
  0x39   :  { %39 = dma.hbm_to_vmem [thread:$0]  %s4560_s19, 128, %s37_s26, [#allocation6]  }
  0x3a   :  { %p3542_p9 = por %p3541_p8, %p3540_p7 }
  0x3c   :  { %p3543_p10 = pnand %p3542_p9, %p3536_p6 }
  0x3e   :  { %3546 = shalt.err (!%p3543_p10)
}
  0x3f   :  { %59 = dma.hbm_to_vmem [thread:$0]  %s4541_s2, 128, %s57_s20, [#allocation9]  }
  0x40   :  { %s3555_s25 = scalar_lea.vmem %s88_s22, 1024  ;;  %p3560_p12 = scmp.lt.s32.totalorder %s88_s22, %s88_s22 }
  0x41   :  { %p3556_p11 = scmp.ne.s32.totalorder %s88_s22, %s3555_s25  ;;  %p3561_p13 = scmp.lt.s32.totalorder %s3555_s25, %s3555_s25 }
  0x43   :  { %p3562_p0 = por %p3561_p13, %p3560_p12 }
  0x45   :  { %p3563_p1 = pnand %p3562_p0, %p3556_p11 }
  0x47   :  { %3566 = shalt.err (!%p3563_p1)
}
  0x48   :  { %93 = dma.hbm_to_vmem [thread:$0]  %s4548_s9, 1024, %s88_s22, [#allocation12], %s3687_s28, %s3687_s28, %s3688_s29  }
  0x49   :  { %s3691_s3 = smov [#allocation16]  }
  0x4a   :  { %s113_s27 = sshll.u32 %s3691_s3, 4  ;;  %s114_s27 = int_to_ptr.vmem [resolvable:$true] %s113_s27 }
  0x4b   :  { %s3575_s30 = scalar_lea.vmem %s114_s27, 1024  ;;  %p3580_p3 = scmp.lt.s32.totalorder %s114_s27, %s114_s27 }
  0x4c   :  { %p3576_p2 = scmp.ne.s32.totalorder %s114_s27, %s3575_s30  ;;  %p3581_p4 = scmp.lt.s32.totalorder %s3575_s30, %s3575_s30 }
  0x4e   :  { %p3582_p5 = por %p3581_p4, %p3580_p3 }
  0x50   :  { %p3583_p6 = pnand %p3582_p5, %p3576_p2 }
  0x52   :  { %3586 = shalt.err (!%p3583_p6)
}
  0x53   :  { %119 = dma.hbm_to_vmem [thread:$0]  %s4551_s12, 1024, %s114_s27, [#allocation15], %s3687_s28, %s3687_s28, %s3688_s29  }
  0x54   :  { %3667 = dma.done.wait [#allocation6], 128  }
  0x55   :  { %3668 = vsyncadd [#allocation6], 4294967168 }
  0x56   :  { %3669 = dma.done.wait [#allocation9], 256  }
  0x57   :  { %3670 = vsyncadd [#allocation9], 4294967040 }
  0x58   :  { %3671 = dma.done.wait [#allocation12], 1152  }
  0x59   :  { %3672 = vsyncadd [#allocation12], 4294966144 }
  0x5a   :  { %3673 = dma.done.wait [#allocation15], 2048  }
  0x5b   :  { %3674 = vsyncadd [#allocation15], 4294965248  ;;  %v3692_v0 = vmov 0   ;;  %v3207_v1 = vld [vmem:[%s4546_s7 + $0xe4] ss:$16 sps:$4 sm:$0xff]   ;;  %v150_v33 = vld [vmem:[#allocation8] sm:$0xff] }
  0x5c   :  { %409 = vmatprep.mubr.bf16.mxu0 %v3692_v0  ;;  %450 = vmatprep.mubr.bf16.mxu1 %v3692_v0  ;;  %v3209_v2 = vld [vmem:[%s4546_s7 + $0xec] ss:$16 sps:$4 sm:$0xff]   ;;  %v3211_v3 = vld [vmem:[%s4546_s7 + $0xe0] ss:$16 sps:$4 sm:$0xff]   ;;  %v3212_v4 = vld [vmem:[%s4546_s7 + $0xe8] ss:$16 sps:$4 sm:$0xff]   ;;  %v184_v36 = vpack.c.bf16 %v150_v33, %v150_v33 }
  0x5d   :  { %3205 = vset.pattern.permute.xlu1 %v3692_v0  ;;  %3206 = vset.pattern.permute.xlu0 %v3692_v0  ;;  %v3213_v5 = vld [vmem:[%s4546_s7 + $0xc4] ss:$16 sps:$4 sm:$0xff]   ;;  %v3215_v6 = vld [vmem:[%s4546_s7 + $0xcc] ss:$16 sps:$4 sm:$0xff]   ;;  %v3217_v7 = vld [vmem:[%s4546_s7 + $0xc0] ss:$16 sps:$4 sm:$0xff]  }
  0x5e   :  { %377 = vmatprep.subr.bf16.mxu0 %v3207_v1  ;;  %418 = vmatprep.subr.bf16.mxu1 %v3209_v2  ;;  %v3218_v8 = vld [vmem:[%s4546_s7 + $0xc8] ss:$16 sps:$4 sm:$0xff]   ;;  %v3219_v9 = vld [vmem:[%s4546_s7 + $0xa4] ss:$16 sps:$4 sm:$0xff]   ;;  %v3221_v10 = vld [vmem:[%s4546_s7 + $0xac] ss:$16 sps:$4 sm:$0xff]  }
  0x5f   :  { %378 = vmatpush1.bf16.msra.mxu0 %v3211_v3  ;;  %419 = vmatpush1.bf16.msra.mxu1 %v3212_v4  ;;  %v3223_v11 = vld [vmem:[%s4546_s7 + $0xa0] ss:$16 sps:$4 sm:$0xff]   ;;  %v3224_v12 = vld [vmem:[%s4546_s7 + $0xa8] ss:$16 sps:$4 sm:$0xff]   ;;  %v3225_v13 = vld [vmem:[%s4546_s7 + $0x84] ss:$16 sps:$4 sm:$0xff]  }
  0x60   :  { %379 = vmatprep.subr.bf16.mxu0 %v3213_v5  ;;  %420 = vmatprep.subr.bf16.mxu1 %v3215_v6  ;;  %v3227_v14 = vld [vmem:[%s4546_s7 + $0x8c] ss:$16 sps:$4 sm:$0xff]   ;;  %v3229_v15 = vld [vmem:[%s4546_s7 + $0x80] ss:$16 sps:$4 sm:$0xff]   ;;  %v3230_v16 = vld [vmem:[%s4546_s7 + $0x88] ss:$16 sps:$4 sm:$0xff]  }
  0x61   :  { %v3231_v17 = vld [vmem:[%s4546_s7 + $0x64] ss:$16 sps:$4 sm:$0xff]   ;;  %v3233_v18 = vld [vmem:[%s4546_s7 + $0x6c] ss:$16 sps:$4 sm:$0xff]   ;;  %v3235_v19 = vld [vmem:[%s4546_s7 + $0x60] ss:$16 sps:$4 sm:$0xff]  }
  0x62   :  { %v3236_v20 = vld [vmem:[%s4546_s7 + $0x68] ss:$16 sps:$4 sm:$0xff]   ;;  %v3237_v21 = vld [vmem:[%s4546_s7 + $0x44] ss:$16 sps:$4 sm:$0xff]   ;;  %v3239_v22 = vld [vmem:[%s4546_s7 + $0x4c] ss:$16 sps:$4 sm:$0xff]  }
  0x63   :  { %380 = vmatpush1.bf16.msra.mxu0 %v3217_v7  ;;  %421 = vmatpush1.bf16.msra.mxu1 %v3218_v8  ;;  %v3241_v23 = vld [vmem:[%s4546_s7 + $0x40] ss:$16 sps:$4 sm:$0xff]   ;;  %v3242_v24 = vld [vmem:[%s4546_s7 + $0x48] ss:$16 sps:$4 sm:$0xff]   ;;  %v3243_v25 = vld [vmem:[%s4546_s7 + $0x24] ss:$16 sps:$4 sm:$0xff]  }
  0x64   :  { %381 = vmatprep.subr.bf16.mxu0 %v3219_v9  ;;  %422 = vmatprep.subr.bf16.mxu1 %v3221_v10  ;;  %v3245_v26 = vld [vmem:[%s4546_s7 + $0x2c] ss:$16 sps:$4 sm:$0xff]   ;;  %v3247_v27 = vld [vmem:[%s4546_s7 + $0x20] ss:$16 sps:$4 sm:$0xff]   ;;  %v3248_v28 = vld [vmem:[%s4546_s7 + $0x28] ss:$16 sps:$4 sm:$0xff]  }
  0x65   :  { %v3249_v29 = vld [vmem:[%s4546_s7 + $0x4] ss:$16 sps:$4 sm:$0xff]   ;;  %v3251_v30 = vld [vmem:[%s4546_s7 + $0xc] ss:$16 sps:$4 sm:$0xff]   ;;  %v3253_v31 = vld [vmem:[%s4546_s7] ss:$16 sps:$4 sm:$0xff]  }
  0x66   :  { %v3254_v32 = vld [vmem:[%s4546_s7 + $0x8] ss:$16 sps:$4 sm:$0xff]   ;;  %v3257_v34 = vld [vmem:[%s4545_s6 + $0xe4] ss:$16 sps:$4 sm:$0xff]   ;;  %v3260_v35 = vld [vmem:[%s4545_s6 + $0xec] ss:$16 sps:$4 sm:$0xff]  }
  0x67   :  { %382 = vmatpush1.bf16.msra.mxu0 %v3223_v11  ;;  %423 = vmatpush1.bf16.msra.mxu1 %v3224_v12  ;;  %v3255_v37 = vld [vmem:[%s4545_s6 + $0xe0] ss:$16 sps:$4 sm:$0xff]   ;;  %v3258_v38 = vld [vmem:[%s4545_s6 + $0xe8] ss:$16 sps:$4 sm:$0xff]   ;;  %v3263_v39 = vld [vmem:[%s4545_s6 + $0xc4] ss:$16 sps:$4 sm:$0xff]  }
  0x68   :  { %383 = vmatprep.subr.bf16.mxu0 %v3225_v13  ;;  %424 = vmatprep.subr.bf16.mxu1 %v3227_v14  ;;  %v3266_v40 = vld [vmem:[%s4545_s6 + $0xcc] ss:$16 sps:$4 sm:$0xff]   ;;  %v3261_v41 = vld [vmem:[%s4545_s6 + $0xc0] ss:$16 sps:$4 sm:$0xff]   ;;  %v3264_v42 = vld [vmem:[%s4545_s6 + $0xc8] ss:$16 sps:$4 sm:$0xff]  }
  0x69   :  { %v3269_v43 = vld [vmem:[%s4545_s6 + $0xa4] ss:$16 sps:$4 sm:$0xff]   ;;  %v3272_v44 = vld [vmem:[%s4545_s6 + $0xac] ss:$16 sps:$4 sm:$0xff]   ;;  %v3267_v45 = vld [vmem:[%s4545_s6 + $0xa0] ss:$16 sps:$4 sm:$0xff]  }
  0x6a   :  { %v3270_v46 = vld [vmem:[%s4545_s6 + $0xa8] ss:$16 sps:$4 sm:$0xff]   ;;  %v3275_v47 = vld [vmem:[%s4545_s6 + $0x84] ss:$16 sps:$4 sm:$0xff]   ;;  %v3278_v48 = vld [vmem:[%s4545_s6 + $0x8c] ss:$16 sps:$4 sm:$0xff]  }
  0x6b   :  { %384 = vmatpush1.bf16.msra.mxu0 %v3229_v15  ;;  %425 = vmatpush1.bf16.msra.mxu1 %v3230_v16  ;;  %v3273_v49 = vld [vmem:[%s4545_s6 + $0x80] ss:$16 sps:$4 sm:$0xff]   ;;  %v3276_v50 = vld [vmem:[%s4545_s6 + $0x88] ss:$16 sps:$4 sm:$0xff]   ;;  %v3281_v51 = vld [vmem:[%s4545_s6 + $0x64] ss:$16 sps:$4 sm:$0xff]  }
  0x6c   :  { %385 = vmatprep.subr.bf16.mxu0 %v3231_v17  ;;  %426 = vmatprep.subr.bf16.mxu1 %v3233_v18  ;;  %v3284_v52 = vld [vmem:[%s4545_s6 + $0x6c] ss:$16 sps:$4 sm:$0xff]   ;;  %v3279_v53 = vld [vmem:[%s4545_s6 + $0x60] ss:$16 sps:$4 sm:$0xff]   ;;  %v3282_v54 = vld [vmem:[%s4545_s6 + $0x68] ss:$16 sps:$4 sm:$0xff]  }
  0x6d   :  { %v3287_v55 = vld [vmem:[%s4545_s6 + $0x44] ss:$16 sps:$4 sm:$0xff]   ;;  %v3290_v56 = vld [vmem:[%s4545_s6 + $0x4c] ss:$16 sps:$4 sm:$0xff]   ;;  %v3285_v57 = vld [vmem:[%s4545_s6 + $0x40] ss:$16 sps:$4 sm:$0xff]  }
  0x6e   :  { %v3288_v58 = vld [vmem:[%s4545_s6 + $0x48] ss:$16 sps:$4 sm:$0xff]   ;;  %v3293_v59 = vld [vmem:[%s4545_s6 + $0x24] ss:$16 sps:$4 sm:$0xff]   ;;  %v3296_v60 = vld [vmem:[%s4545_s6 + $0x2c] ss:$16 sps:$4 sm:$0xff]  }
  0x6f   :  { %386 = vmatpush1.bf16.msra.mxu0 %v3235_v19  ;;  %427 = vmatpush1.bf16.msra.mxu1 %v3236_v20  ;;  %v3291_v61 = vld [vmem:[%s4545_s6 + $0x20] ss:$16 sps:$4 sm:$0xff]   ;;  %v3294_v62 = vld [vmem:[%s4545_s6 + $0x28] ss:$16 sps:$4 sm:$0xff]   ;;  %v3299_v63 = vld [vmem:[%s4545_s6 + $0x4] ss:$16 sps:$4 sm:$0xff]  }
  0x70   :  { %387 = vmatprep.subr.bf16.mxu0 %v3237_v21  ;;  %428 = vmatprep.subr.bf16.mxu1 %v3239_v22  ;;  %v3297_v1 = vld [vmem:[%s4545_s6] ss:$16 sps:$4 sm:$0xff]   ;;  %v3300_v2 = vld [vmem:[%s4545_s6 + $0x8] ss:$16 sps:$4 sm:$0xff]   ;;  %v3693_v6 = vmov 0.0   ;;  %vm3694_vm0 = vmmov 0  }
  0x71   :  { %v148_v3 = vld [vmem:[#allocation5] sm:$0xff]  ;;  %v3307_v10 = vld [vmem:[%s4544_s5 + $0x28] sm:$0xff]   ;;  %v3309_v12 = vld [vmem:[%s4544_s5 + $0x20] sm:$0xff]   ;;  %vm1667_vm1 = vcmask 57344   ;;  %vm1792_vm2 = vcmask 1043456   ;;  %vm1788_vm3 = vcmask 64512  }
  0x72   :  { %v149_v4 = vpack.c.bf16 %v148_v3, %v148_v3  ;;  %v3303_v5 = vld [vmem:[%s4544_s5 + $0x38] sm:$0xff]   ;;  %v3305_v8 = vld [vmem:[%s4544_s5 + $0x30] sm:$0xff]   ;;  %v3308_v11 = vld [vmem:[%s4544_s5 + $0x68] sm:$0xff]   ;;  %vm2304_vm4 = vcmask 1041409   ;;  %vm2307_vm5 = vcmask 1042434   ;;  %vm2310_vm6 = vcmask 1043459  }
  0x73   :  { %388 = vmatpush1.bf16.msra.mxu0 %v3241_v23  ;;  %429 = vmatpush1.bf16.msra.mxu1 %v3242_v24  ;;  %v3304_v7 = vld [vmem:[%s4544_s5 + $0x78] sm:$0xff]   ;;  %v3306_v9 = vld [vmem:[%s4544_s5 + $0x70] sm:$0xff]   ;;  %v3310_v13 = vld [vmem:[%s4544_s5 + $0x60] sm:$0xff]   ;;  %vm2313_vm7 = vcmask 1044484   ;;  %vm2316_vm8 = vcmask 1045509   ;;  %vm2319_vm9 = vcmask 1046534  }
  0x74   :  { %389 = vmatprep.subr.bf16.mxu0 %v3243_v25  ;;  %430 = vmatprep.subr.bf16.mxu1 %v3245_v26  ;;  %v3311_v14 = vld [vmem:[%s4544_s5 + $0x18] sm:$0xff]   ;;  %v3313_v16 = vld [vmem:[%s4544_s5 + $0x10] sm:$0xff]   ;;  %v3315_v18 = vld [vmem:[%s4544_s5 + $0x8] sm:$0xff]   ;;  %vm2322_vm10 = vcmask 1047559   ;;  %vm2425_vm11 = vcmask 7168  }
  0x75   :  { %v3312_v15 = vld [vmem:[%s4544_s5 + $0x58] sm:$0xff]   ;;  %v3314_v17 = vld [vmem:[%s4544_s5 + $0x50] sm:$0xff]   ;;  %v3316_v19 = vld [vmem:[%s4544_s5 + $0x48] sm:$0xff]   ;;  %2427 = vst.msk [vmem:[#allocation4] sm:$0xff] %vm2425_vm11, %v3693_v6 }
  0x76   :  { %v3317_v20 = vld [vmem:[%s4544_s5] sm:$0xff]  }
  0x77   :  { %390 = vmatpush1.bf16.msra.mxu0 %v3247_v27  ;;  %431 = vmatpush1.bf16.msra.mxu1 %v3248_v28  ;;  %v3318_v21 = vld [vmem:[%s4544_s5 + $0x40] sm:$0xff]  }
  0x78   :  { %391 = vmatprep.subr.bf16.mxu0 %v3249_v29  ;;  %432 = vmatprep.subr.bf16.mxu1 %v3251_v30  ;;  %v703_v30 = vlaneseq  ;;  %v701_v33 = vld [vmem:[%s4547_s8] sm:$0xf] }
  0x7b   :  { %392 = vmatpush1.bf16.msra.mxu0 %v3253_v31  ;;  %433 = vmatpush1.bf16.msra.mxu1 %v3254_v32  ;;  %v704_v31 = vshrl.u32 %v703_v30, 7  ;;  %v3326_v30 = vld [vmem:[%s4544_s5 + $0xe0] sm:$0xff]  }
  0x7c   :  { %619 = vmatprep.subr.bf16.mxu0 %v3257_v34  ;;  %660 = vmatprep.subr.bf16.mxu1 %v3260_v35 }
  0x7d   :  { %v705_v32 = vsub.s32 0, %v704_v31  ;;  %v709_v34 = vsub.s32 1, %v704_v31 }
  0x7e   :  { %410 = vmatmul.mubr.bf16.vlgmr.msra.gmra.mxu0 %v184_v36  ;;  %451 = vmatmul.mubr.bf16.vlgmr.msra.gmra.mxu1 %v184_v36 }
  0x7f   :  { %620 = vmatpush1.bf16.msra.mxu0 %v3255_v37  ;;  %661 = vmatpush1.bf16.msra.mxu1 %v3258_v38  ;;  %v706_v35 = vrot.slane %v701_v33, %v705_v32  ;;  %v3328_v32 = vld [vmem:[%s4544_s5 + $0xd8] sm:$0xff]  }
  0x80   :  { %621 = vmatprep.subr.bf16.mxu0 %v3263_v39  ;;  %662 = vmatprep.subr.bf16.mxu1 %v3266_v40  ;;  %v710_v39 = vrot.slane %v701_v33, %v709_v34  ;;  %v3330_v34 = vld [vmem:[%s4544_s5 + $0xd0] sm:$0xff]  }
  0x81   :  { %651 = vmatprep.mubr.bf16.mxu0 %v3692_v0  ;;  %692 = vmatprep.mubr.bf16.mxu1 %v3692_v0  ;;  %v3302_v0 = vld [vmem:[%s4545_s6 + $0xc] ss:$16 sps:$4 sm:$0xff]  }
  0x83   :  { %622 = vmatpush1.bf16.msra.mxu0 %v3261_v41  ;;  %663 = vmatpush1.bf16.msra.mxu1 %v3264_v42 }
  0x84   :  { %623 = vmatprep.subr.bf16.mxu0 %v3269_v43  ;;  %664 = vmatprep.subr.bf16.mxu1 %v3272_v44 }
  0x87   :  { %624 = vmatpush1.bf16.msra.mxu0 %v3267_v45  ;;  %665 = vmatpush1.bf16.msra.mxu1 %v3270_v46 }
  0x88   :  { %625 = vmatprep.subr.bf16.mxu0 %v3275_v47  ;;  %666 = vmatprep.subr.bf16.mxu1 %v3278_v48  ;;  %v717_v48 = vsub.s32 3, %v704_v31 }
  0x8b   :  { %626 = vmatpush1.bf16.msra.mxu0 %v3273_v49  ;;  %667 = vmatpush1.bf16.msra.mxu1 %v3276_v50 }
  0x8c   :  { %627 = vmatprep.subr.bf16.mxu0 %v3281_v51  ;;  %668 = vmatprep.subr.bf16.mxu1 %v3284_v52 }
  0x8f   :  { %628 = vmatpush1.bf16.msra.mxu0 %v3279_v53  ;;  %669 = vmatpush1.bf16.msra.mxu1 %v3282_v54  ;;  %v718_v53 = vrot.slane %v701_v33, %v717_v48  ;;  %v713_v54 = vsub.s32 2, %v704_v31  ;;  %v3340_v48 = vld [vmem:[%s4544_s5 + $0x168] sm:$0xff]  }
  0x90   :  { %629 = vmatprep.subr.bf16.mxu0 %v3287_v55  ;;  %670 = vmatprep.subr.bf16.mxu1 %v3290_v56 }
  0x93   :  { %630 = vmatpush1.bf16.msra.mxu0 %v3285_v57  ;;  %671 = vmatpush1.bf16.msra.mxu1 %v3288_v58  ;;  %v714_v57 = vrot.slane %v701_v33, %v713_v54  ;;  %v3329_v33 = vld [vmem:[%s4544_s5 + $0x90] sm:$0xff]  }
  0x94   :  { %631 = vmatprep.subr.bf16.mxu0 %v3293_v59  ;;  %672 = vmatprep.subr.bf16.mxu1 %v3296_v60  ;;  %v3345_v54 = vld [vmem:[%s4544_s5 + $0x110] sm:$0xff]  }
  0x97   :  { %632 = vmatpush1.bf16.msra.mxu0 %v3291_v61  ;;  %673 = vmatpush1.bf16.msra.mxu1 %v3294_v62 }
  0x98   :  { %633 = vmatprep.subr.bf16.mxu0 %v3299_v63  ;;  %674 = vmatprep.subr.bf16.mxu1 %v3302_v0 }
  0x9b   :  { %634 = vmatpush1.bf16.msra.mxu0 %v3297_v1  ;;  %675 = vmatpush1.bf16.msra.mxu1 %v3300_v2  ;;  %v151_v2 = vld [vmem:[#allocation10] sm:$0xff] }
  0x9c   :  { %2917 = vmatprep.subr.bf16.mxu0 %v3693_v6  ;;  %2937 = vmatprep.subr.bf16.mxu1 %v3693_v6 }
  0x9e   :  { %652 = vmatmul.mubr.bf16.vlgmr.msra.gmra.mxu0 %v149_v4  ;;  %693 = vmatmul.mubr.bf16.vlgmr.msra.gmra.mxu1 %v149_v4 }
  0x9f   :  { %2918 = vmatpush3.bf16.msra.mxu0 %v3303_v5  ;;  %2938 = vmatpush3.bf16.msra.mxu1 %v3304_v7 }
  0xa0   :  { %2919 = vmatprep.subr.bf16.mxu0 %v3693_v6  ;;  %2939 = vmatprep.subr.bf16.mxu1 %v3693_v6 }
  0xa1   :  { %2933 = vmatprep.mubr.msk.bf16.mxu0 %vm3694_vm0, %v3693_v6  ;;  %2953 = vmatprep.mubr.msk.bf16.mxu1 %vm3694_vm0, %v3693_v6 }
  0xa3   :  { %2920 = vmatpush3.bf16.msra.mxu0 %v3305_v8  ;;  %2940 = vmatpush3.bf16.msra.mxu1 %v3306_v9 }
  0xa4   :  { %2921 = vmatprep.subr.bf16.mxu0 %v3693_v6  ;;  %2941 = vmatprep.subr.bf16.mxu1 %v3693_v6 }
  0xa7   :  { %2922 = vmatpush3.bf16.msra.mxu0 %v3307_v10  ;;  %2942 = vmatpush3.bf16.msra.mxu1 %v3308_v11  ;;  %v3695_v10 = vmov 1966171168  }
  0xa8   :  { %2923 = vmatprep.subr.bf16.mxu0 %v3693_v6  ;;  %2943 = vmatprep.subr.bf16.mxu1 %v3693_v6  ;;  %v764_v11 = vunpack.c.l.s4 %v3695_v10  ;;  %v3358_v10 = vld [vmem:[%s4544_s5 + $0x1e0] sm:$0xff]  }
  0xab   :  { %2924 = vmatpush3.bf16.msra.mxu0 %v3309_v12  ;;  %2944 = vmatpush3.bf16.msra.mxu1 %v3310_v13  ;;  %v765_v12 = vunpack.c.0.s8 %v764_v11  ;;  %v3359_v11 = vld [vmem:[%s4544_s5 + $0x198] sm:$0xff]  }
  0xac   :  { %2925 = vmatprep.subr.bf16.mxu0 %v3693_v6  ;;  %2945 = vmatprep.subr.bf16.mxu1 %v3693_v6 }
  0xaf   :  { %2926 = vmatpush3.bf16.msra.mxu0 %v3311_v14  ;;  %2946 = vmatpush3.bf16.msra.mxu1 %v3312_v15  ;;  %v4092_v14 = vsub.s32 %v765_v12, %v704_v31  ;;  %v3327_v31 = vld [vmem:[%s4544_s5 + $0x98] sm:$0xff]  }
  0xb0   :  { %2927 = vmatprep.subr.bf16.mxu0 %v3693_v6  ;;  %2947 = vmatprep.subr.bf16.mxu1 %v3693_v6  ;;  %v3360_v12 = vld [vmem:[%s4544_s5 + $0x1d8] sm:$0xff]  }
  0xb3   :  { %2928 = vmatpush3.bf16.msra.mxu0 %v3313_v16  ;;  %2948 = vmatpush3.bf16.msra.mxu1 %v3314_v17 }
  0xb4   :  { %2929 = vmatprep.subr.bf16.mxu0 %v3693_v6  ;;  %2949 = vmatprep.subr.bf16.mxu1 %v3693_v6 }
  0xb7   :  { %2930 = vmatpush3.bf16.msra.mxu0 %v3315_v18  ;;  %2950 = vmatpush3.bf16.msra.mxu1 %v3316_v19 }
  0xb8   :  { %2931 = vmatprep.subr.bf16.mxu0 %v3693_v6  ;;  %2951 = vmatprep.subr.bf16.mxu1 %v3693_v6 }
  0xbb   :  { %2932 = vmatpush3.bf16.msra.mxu0 %v3317_v20  ;;  %2952 = vmatpush3.bf16.msra.mxu1 %v3318_v21  ;;  %v3319_v20 = vld [vmem:[%s4544_s5 + $0xb8] sm:$0xff]  }
  0xbc   :  { %2957 = vmatprep.subr.bf16.mxu0 %v3693_v6  ;;  %2977 = vmatprep.subr.bf16.mxu1 %v3693_v6 }
 0x13e   :  { %v411_v22 = vpop.f32.mrf.mxu0  ;;  %v452_v23 = vpop.f32.mrf.mxu1 }
 0x140   :  { %v413_v24 = vpop.f32.mrf.mxu0  ;;  %v454_v25 = vpop.f32.mrf.mxu1 }
 0x142   :  { %v415_v26 = vpop.f32.mrf.mxu0  ;;  %v456_v27 = vpop.f32.mrf.mxu1 }
 0x143   :  { %v3322_v26 = vld [vmem:[%s4544_s5 + $0xf0] sm:$0xff]   ;;  %v3323_v27 = vld [vmem:[%s4544_s5 + $0xa8] sm:$0xff]  }
 0x144   :  { %v416_v28 = vpop.f32.mrf.mxu0  ;;  %v457_v29 = vpop.f32.mrf.mxu1 }
 0x145   :  { %v3324_v28 = vld [vmem:[%s4544_s5 + $0xe8] sm:$0xff]   ;;  %v3325_v29 = vld [vmem:[%s4544_s5 + $0xa0] sm:$0xff]  }
 0x15e   :  { %v653_v36 = vpop.f32.mrf.mxu0  ;;  %v694_v37 = vpop.f32.mrf.mxu1 }
 0x15f   :  { %v654_v38 = vadd.f32 %v653_v36, %v411_v22  ;;  %v695_v56 = vadd.f32 %v694_v37, %v452_v23  ;;  %v3320_v23 = vld [vmem:[%s4544_s5 + $0xf8] sm:$0xff]   ;;  %v3332_v36 = vld [vmem:[%s4544_s5 + $0xc8] sm:$0xff]   ;;  %v3333_v37 = vld [vmem:[%s4544_s5 + $0x80] sm:$0xff]  }
 0x160   :  { %v655_v40 = vpop.f32.mrf.mxu0  ;;  %v696_v41 = vpop.f32.mrf.mxu1 }
 0x161   :  { %v723_v42 = vadd.f32 %v706_v35, %v654_v38  ;;  %v656_v43 = vadd.f32 %v655_v40, %v413_v24  ;;  %v697_v52 = vadd.f32 %v696_v41, %v454_v25  ;;  %v725_v60 = vadd.f32 %v714_v57, %v695_v56  ;;  %v3321_v25 = vld [vmem:[%s4544_s5 + $0xb0] sm:$0xff]   ;;  %v3331_v35 = vld [vmem:[%s4544_s5 + $0x88] sm:$0xff]   ;;  %v3335_v41 = vld [vmem:[%s4544_s5 + $0x138] sm:$0xff]  }
 0x162   :  { %v657_v44 = vpop.f32.mrf.mxu0  ;;  %v698_v45 = vpop.f32.mrf.mxu1  ;;  %v3347_v57 = vld [vmem:[%s4544_s5 + $0x108] sm:$0xff]  }
 0x163   :  { %v2701_v46 = vmul.f32 -1.442695, %v723_v42  ;;  %v724_v47 = vadd.f32 %v710_v39, %v656_v43  ;;  %v726_v55 = vadd.f32 %v718_v53, %v697_v52  ;;  %v3334_v39 = vld [vmem:[%s4544_s5 + $0xc0] sm:$0xff]   ;;  %v3336_v43 = vld [vmem:[%s4544_s5 + $0x178] sm:$0xff]   ;;  %v3337_v45 = vld [vmem:[%s4544_s5 + $0x130] sm:$0xff]  }
 0x164   :  { %v658_v49 = vpop.f32.mrf.mxu0  ;;  %v699_v50 = vpop.f32.mrf.mxu1  ;;  %v3344_v52 = vld [vmem:[%s4544_s5 + $0x158] sm:$0xff]  }
 0x165   :  { %3391 = vpow2.f32 %v2701_v46  ;;  %v2702_v51 = vmul.f32 -1.442695, %v724_v47  ;;  %v2703_v58 = vmul.f32 -1.442695, %v726_v55  ;;  %v3338_v46 = vld [vmem:[%s4544_s5 + $0x170] sm:$0xff]   ;;  %v3339_v47 = vld [vmem:[%s4544_s5 + $0x128] sm:$0xff]  }
 0x166   :  { %v3341_v49 = vld [vmem:[%s4544_s5 + $0x120] sm:$0xff]   ;;  %v3346_v55 = vld [vmem:[%s4544_s5 + $0x150] sm:$0xff]  }
 0x167   :  { %3393 = vpow2.f32 %v2702_v51  ;;  %v3342_v50 = vld [vmem:[%s4544_s5 + $0x160] sm:$0xff]   ;;  %v3343_v51 = vld [vmem:[%s4544_s5 + $0x118] sm:$0xff]  }
 0x168   :  { %3395 = vpow2.f32 %v2703_v58  ;;  %v3348_v58 = vld [vmem:[%s4544_s5 + $0x148] sm:$0xff]  }
 0x172   :  { %v3392_v59 = vpop.eup %3391 }
 0x173   :  { %v730_v61 = vadd.f32 1.0, %v3392_v59 }
 0x174   :  { %v3394_v62 = vpop.eup %3393 }
 0x175   :  { %3397 = vrcp.f32 %v730_v61  ;;  %v736_v63 = vadd.f32 1.0, %v3394_v62  ;;  %v3396_v0 = vpop.eup %3395  ;;  %v3350_v62 = vld [vmem:[%s4544_s5 + $0x140] sm:$0xff]  }
 0x176   :  { %3399 = vtanh.f32 %v725_v60  ;;  %v743_v5 = vadd.f32 1.0, %v3396_v0  ;;  %v3349_v60 = vld [vmem:[%s4544_s5 + $0x100] sm:$0xff]   ;;  %v3351_v0 = vld [vmem:[%s4544_s5 + $0x1b8] sm:$0xff]  }
 0x177   :  { %3401 = vrcp.f32 %v736_v63 }
 0x178   :  { %3403 = vrcp.f32 %v743_v5  ;;  %v3354_v5 = vld [vmem:[%s4544_s5 + $0x1f0] sm:$0xff]  }
 0x182   :  { %v3398_v1 = vpop.eup %3397 }
 0x183   :  { %v3400_v3 = vpop.eup %3399 }
 0x184   :  { %v3402_v4 = vpop.eup %3401  ;;  %v747_v7 = vmul.f32 %v3400_v3, %v3398_v1 }
 0x185   :  { %v746_v8 = vmul.f32 %v3402_v4, %v151_v2  ;;  %v3404_v13 = vpop.eup %3403  ;;  %v3352_v2 = vld [vmem:[%s4544_s5 + $0x1f8] sm:$0xff]   ;;  %v3353_v4 = vld [vmem:[%s4544_s5 + $0x1b0] sm:$0xff]  }
 0x187   :  { %v748_v9 = vadd.f32 %v747_v7, %v746_v8  ;;  %v3355_v7 = vld [vmem:[%s4544_s5 + $0x1a8] sm:$0xff]  }
 0x188   :  { %v3356_v8 = vld [vmem:[%s4544_s5 + $0x1e8] sm:$0xff]  }
 0x189   :  { %3405 = vtanh.f32 %v748_v9  ;;  %752 = vst [vmem:[#allocation21] sm:$0xff] %v748_v9  ;;  %v3357_v9 = vld [vmem:[%s4544_s5 + $0x1a0] sm:$0xff]  }
 0x196   :  { %v3406_v15 = vpop.eup %3405 }
 0x197   :  { %v4094_v16 = vmul.f32 %v3406_v15, %v3404_v13  ;;  %v3361_v13 = vld [vmem:[%s4544_s5 + $0x190] sm:$0xff]   ;;  %v3363_v15 = vld [vmem:[%s4544_s5 + $0x188] sm:$0xff]  }
 0x199   :  { %v769_v17 = vrot.slane %v4094_v16, %v4092_v14  ;;  %751 = vst [vmem:[#allocation20] sm:$0xff] %v4094_v16  ;;  %v762_v53 = vcombine.high %v4094_v16, %v4094_v16 }
 0x19b   :  { %v785_v18 = vrot.slane %v769_v17, %v4092_v14  ;;  %v777_v19 = vcombine.high %v769_v17, %v769_v17  ;;  %v776_v56 = vrot.slane %v762_v53, %v4092_v14  ;;  %v3364_v17 = vld [vmem:[%s4544_s5 + $0x1c8] sm:$0xff]  }
 0x19d   :  { %v819_v21 = vpack.c.bf16 %v785_v18, %v785_v18  ;;  %v799_v22 = vrot.slane %v777_v19, %v4092_v14  ;;  %v807_v38 = vcombine.high %v785_v18, %v785_v18  ;;  %v778_v59 = vcombine.high %v776_v56, %v776_v56  ;;  %v3365_v18 = vld [vmem:[%s4544_s5 + $0x180] sm:$0xff]  }
 0x19e   :  { %v792_v61 = vrot.slane %v776_v56, %v4092_v14 }
 0x19f   :  { %2934 = vmatmul.mubr.bf16.vlgmr.msra.gmra.mxu0 %v819_v21  ;;  %v820_v24 = vpack.c.bf16 %v799_v22, %v799_v22  ;;  %v809_v40 = vcombine.high %v799_v22, %v799_v22  ;;  %v821_v42 = vpack.c.bf16 %v807_v38, %v807_v38  ;;  %v806_v63 = vrot.slane %v778_v59, %v4092_v14  ;;  %v3362_v14 = vld [vmem:[%s4544_s5 + $0x1d0] sm:$0xff]   ;;  %v4328_v38 = vld [vmem:[#allocation11 + $0x2] sm:$0x1] }
 0x1a0   :  { %2958 = vmatpush3.bf16.msra.mxu0 %v3319_v20  ;;  %2973 = vmatprep.mubr.msk.bf16.mxu0 %vm3694_vm0, %v3693_v6  ;;  %v823_v1 = vpack.c.bf16 %v792_v61, %v792_v61  ;;  %v808_v19 = vcombine.high %v792_v61, %v792_v61  ;;  %v3366_v20 = vld [vmem:[%s4544_s5 + $0x1c0] sm:$0xff]  }
 0x1a1   :  { %2954 = vmatmul.mubr.bf16.vlgmr.msra.gmra.mxu1 %v820_v24  ;;  %2959 = vmatprep.subr.bf16.mxu0 %v3693_v6  ;;  %v822_v44 = vpack.c.bf16 %v809_v40, %v809_v40  ;;  %v824_v3 = vpack.c.bf16 %v806_v63, %v806_v63  ;;  %v810_v21 = vcombine.high %v806_v63, %v806_v63  ;;  %v4314_v24 = vld [vmem:[#allocation11] sm:$0x1]  ;;  %v4330_v40 = vld [vmem:[#allocation11 + $0x3] sm:$0x1] }
 0x1a2   :  { %2978 = vmatpush3.bf16.msra.mxu1 %v3320_v23  ;;  %2993 = vmatprep.mubr.msk.bf16.mxu1 %vm3694_vm0, %v3693_v6  ;;  %v825_v22 = vpack.c.bf16 %v808_v19, %v808_v19 }
 0x1a3   :  { %2979 = vmatprep.subr.bf16.mxu1 %v3693_v6  ;;  %v826_v23 = vpack.c.bf16 %v810_v21, %v810_v21 }
 0x1a4   :  { %2960 = vmatpush3.bf16.msra.mxu0 %v3321_v25 }
 0x1a5   :  { %2961 = vmatprep.subr.bf16.mxu0 %v3693_v6 }
 0x1a6   :  { %2980 = vmatpush3.bf16.msra.mxu1 %v3322_v26  ;;  %v4316_v26 = vld [vmem:[#allocation11 + $0x1] sm:$0x1] }
 0x1a7   :  { %2981 = vmatprep.subr.bf16.mxu1 %v3693_v6 }
 0x1a8   :  { %2962 = vmatpush3.bf16.msra.mxu0 %v3323_v27 }
 0x1a9   :  { %2963 = vmatprep.subr.bf16.mxu0 %v3693_v6 }
 0x1aa   :  { %2982 = vmatpush3.bf16.msra.mxu1 %v3324_v28 }
 0x1ab   :  { %2983 = vmatprep.subr.bf16.mxu1 %v3693_v6 }
 0x1ac   :  { %2964 = vmatpush3.bf16.msra.mxu0 %v3325_v29 }
 0x1ad   :  { %2965 = vmatprep.subr.bf16.mxu0 %v3693_v6 }
 0x1ae   :  { %2984 = vmatpush3.bf16.msra.mxu1 %v3326_v30 }
 0x1af   :  { %2985 = vmatprep.subr.bf16.mxu1 %v3693_v6 }
 0x1b0   :  { %2966 = vmatpush3.bf16.msra.mxu0 %v3327_v31 }
 0x1b1   :  { %2967 = vmatprep.subr.bf16.mxu0 %v3693_v6 }
 0x1b2   :  { %2986 = vmatpush3.bf16.msra.mxu1 %v3328_v32 }
 0x1b3   :  { %2987 = vmatprep.subr.bf16.mxu1 %v3693_v6 }
 0x1b4   :  { %2968 = vmatpush3.bf16.msra.mxu0 %v3329_v33 }
 0x1b5   :  { %2969 = vmatprep.subr.bf16.mxu0 %v3693_v6 }
 0x1b6   :  { %2988 = vmatpush3.bf16.msra.mxu1 %v3330_v34 }
 0x1b7   :  { %2989 = vmatprep.subr.bf16.mxu1 %v3693_v6 }
 0x1b8   :  { %2970 = vmatpush3.bf16.msra.mxu0 %v3331_v35 }
 0x1b9   :  { %2971 = vmatprep.subr.bf16.mxu0 %v3693_v6 }
 0x1ba   :  { %2990 = vmatpush3.bf16.msra.mxu1 %v3332_v36 }
 0x1bb   :  { %2991 = vmatprep.subr.bf16.mxu1 %v3693_v6 }
 0x1bc   :  { %2972 = vmatpush3.bf16.msra.mxu0 %v3333_v37 }
 0x1bd   :  { %2997 = vmatprep.subr.bf16.mxu0 %v3693_v6 }
 0x1be   :  { %2992 = vmatpush3.bf16.msra.mxu1 %v3334_v39 }
 0x1bf   :  { %2974 = vmatmul.mubr.bf16.vlgmr.msra.gmra.mxu0 %v821_v42  ;;  %3017 = vmatprep.subr.bf16.mxu1 %v3693_v6 }
 0x1c0   :  { %2998 = vmatpush3.bf16.msra.mxu0 %v3335_v41  ;;  %3013 = vmatprep.mubr.msk.bf16.mxu0 %vm3694_vm0, %v3693_v6 }
 0x1c1   :  { %2994 = vmatmul.mubr.bf16.vlgmr.msra.gmra.mxu1 %v822_v44  ;;  %2999 = vmatprep.subr.bf16.mxu0 %v3693_v6 }
 0x1c2   :  { %3018 = vmatpush3.bf16.msra.mxu1 %v3336_v43  ;;  %3033 = vmatprep.mubr.msk.bf16.mxu1 %vm3694_vm0, %v3693_v6 }
 0x1c3   :  { %3019 = vmatprep.subr.bf16.mxu1 %v3693_v6 }
 0x1c4   :  { %3000 = vmatpush3.bf16.msra.mxu0 %v3337_v45 }
 0x1c5   :  { %3001 = vmatprep.subr.bf16.mxu0 %v3693_v6 }
 0x1c6   :  { %3020 = vmatpush3.bf16.msra.mxu1 %v3338_v46 }
 0x1c7   :  { %3021 = vmatprep.subr.bf16.mxu1 %v3693_v6 }
 0x1c8   :  { %3002 = vmatpush3.bf16.msra.mxu0 %v3339_v47 }
 0x1c9   :  { %3003 = vmatprep.subr.bf16.mxu0 %v3693_v6 }
 0x1ca   :  { %3022 = vmatpush3.bf16.msra.mxu1 %v3340_v48 }
 0x1cb   :  { %3023 = vmatprep.subr.bf16.mxu1 %v3693_v6 }
 0x1cc   :  { %3004 = vmatpush3.bf16.msra.mxu0 %v3341_v49 }
 0x1cd   :  { %3005 = vmatprep.subr.bf16.mxu0 %v3693_v6 }
 0x1ce   :  { %3024 = vmatpush3.bf16.msra.mxu1 %v3342_v50 }
 0x1cf   :  { %3025 = vmatprep.subr.bf16.mxu1 %v3693_v6 }
 0x1d0   :  { %3006 = vmatpush3.bf16.msra.mxu0 %v3343_v51 }
 0x1d1   :  { %3007 = vmatprep.subr.bf16.mxu0 %v3693_v6 }
 0x1d2   :  { %3026 = vmatpush3.bf16.msra.mxu1 %v3344_v52  ;;  %v4342_v52 = vld [vmem:[#allocation11 + $0x4] sm:$0x1] }
 0x1d3   :  { %3027 = vmatprep.subr.bf16.mxu1 %v3693_v6 }
 0x1d4   :  { %3008 = vmatpush3.bf16.msra.mxu0 %v3345_v54  ;;  %v4344_v54 = vld [vmem:[#allocation11 + $0x5] sm:$0x1] }
 0x1d5   :  { %3009 = vmatprep.subr.bf16.mxu0 %v3693_v6 }
 0x1d6   :  { %3028 = vmatpush3.bf16.msra.mxu1 %v3346_v55 }
 0x1d7   :  { %3029 = vmatprep.subr.bf16.mxu1 %v3693_v6 }
 0x1d8   :  { %3010 = vmatpush3.bf16.msra.mxu0 %v3347_v57 }
 0x1d9   :  { %3011 = vmatprep.subr.bf16.mxu0 %v3693_v6 }
 0x1da   :  { %3030 = vmatpush3.bf16.msra.mxu1 %v3348_v58 }
 0x1db   :  { %3031 = vmatprep.subr.bf16.mxu1 %v3693_v6 }
 0x1dc   :  { %3012 = vmatpush3.bf16.msra.mxu0 %v3349_v60 }
 0x1dd   :  { %3037 = vmatprep.subr.bf16.mxu0 %v3693_v6 }
 0x1de   :  { %3032 = vmatpush3.bf16.msra.mxu1 %v3350_v62 }
 0x1df   :  { %3014 = vmatmul.mubr.bf16.vlgmr.msra.gmra.mxu0 %v823_v1  ;;  %3057 = vmatprep.subr.bf16.mxu1 %v3693_v6 }
 0x1e0   :  { %3038 = vmatpush3.bf16.msra.mxu0 %v3351_v0  ;;  %3053 = vmatprep.mubr.msk.bf16.mxu0 %vm3694_vm0, %v3693_v6 }
 0x1e1   :  { %3034 = vmatmul.mubr.bf16.vlgmr.msra.gmra.mxu1 %v824_v3  ;;  %3039 = vmatprep.subr.bf16.mxu0 %v3693_v6 }
 0x1e2   :  { %3058 = vmatpush3.bf16.msra.mxu1 %v3352_v2  ;;  %3073 = vmatprep.mubr.msk.bf16.mxu1 %vm3694_vm0, %v3693_v6  ;;  %v4356_v2 = vld [vmem:[#allocation11 + $0x6] sm:$0x1] }
 0x1e3   :  { %3059 = vmatprep.subr.bf16.mxu1 %v3693_v6 }
 0x1e4   :  { %3040 = vmatpush3.bf16.msra.mxu0 %v3353_v4  ;;  %v4358_v4 = vld [vmem:[#allocation11 + $0x7] sm:$0x1] }
 0x1e5   :  { %3041 = vmatprep.subr.bf16.mxu0 %v3693_v6 }
 0x1e6   :  { %3060 = vmatpush3.bf16.msra.mxu1 %v3354_v5 }
 0x1e7   :  { %3061 = vmatprep.subr.bf16.mxu1 %v3693_v6 }
 0x1e8   :  { %3042 = vmatpush3.bf16.msra.mxu0 %v3355_v7 }
 0x1e9   :  { %3043 = vmatprep.subr.bf16.mxu0 %v3693_v6 }
 0x1ea   :  { %3062 = vmatpush3.bf16.msra.mxu1 %v3356_v8 }
 0x1eb   :  { %3063 = vmatprep.subr.bf16.mxu1 %v3693_v6 }
 0x1ec   :  { %3044 = vmatpush3.bf16.msra.mxu0 %v3357_v9 }
 0x1ed   :  { %3045 = vmatprep.subr.bf16.mxu0 %v3693_v6 }
 0x1ee   :  { %3064 = vmatpush3.bf16.msra.mxu1 %v3358_v10 }
 0x1ef   :  { %3065 = vmatprep.subr.bf16.mxu1 %v3693_v6 }
 0x1f0   :  { %3046 = vmatpush3.bf16.msra.mxu0 %v3359_v11 }
 0x1f1   :  { %3047 = vmatprep.subr.bf16.mxu0 %v3693_v6 }
 0x1f2   :  { %3066 = vmatpush3.bf16.msra.mxu1 %v3360_v12 }
 0x1f3   :  { %3067 = vmatprep.subr.bf16.mxu1 %v3693_v6 }
 0x1f4   :  { %3048 = vmatpush3.bf16.msra.mxu0 %v3361_v13 }
 0x1f5   :  { %3049 = vmatprep.subr.bf16.mxu0 %v3693_v6 }
 0x1f6   :  { %3068 = vmatpush3.bf16.msra.mxu1 %v3362_v14 }
 0x1f7   :  { %3069 = vmatprep.subr.bf16.mxu1 %v3693_v6 }
 0x1f8   :  { %3050 = vmatpush3.bf16.msra.mxu0 %v3363_v15 }
 0x1f9   :  { %3051 = vmatprep.subr.bf16.mxu0 %v3693_v6 }
 0x1fa   :  { %3070 = vmatpush3.bf16.msra.mxu1 %v3364_v17 }
 0x1fb   :  { %3071 = vmatprep.subr.bf16.mxu1 %v3693_v6 }
 0x1fc   :  { %3052 = vmatpush3.bf16.msra.mxu0 %v3365_v18 }
 0x1fd   :  { %3101 = vmatprep.subr.bf16.mxu0 %v3693_v6 }
 0x1fe   :  { %3072 = vmatpush3.bf16.msra.mxu1 %v3366_v20 }
 0x1ff   :  { %3054 = vmatmul.mubr.bf16.vlgmr.msra.gmra.mxu0 %v825_v22  ;;  %3077 = vmatprep.subr.bf16.mxu1 %v3693_v6 }
 0x200   :  { %3103 = vmatprep.mubr.msk.bf16.mxu0 %vm3694_vm0, %v3693_v6 }
 0x201   :  { %3074 = vmatmul.mubr.bf16.vlgmr.msra.gmra.mxu1 %v826_v23 }
 0x202   :  { %3079 = vmatprep.mubr.msk.bf16.mxu1 %vm3694_vm0, %v3693_v6 }
 0x25f   :  { %v1037_v25 = vpop.f32.mrf.mxu0 }
 0x260   :  { %v4319_v27 = vmul.f32 %v1037_v25, %v4314_v24 }
 0x261   :  { %v2935_v28 = vpop.f32.mrf.mxu0  ;;  %v1125_v29 = vpop.f32.mrf.mxu1 }
 0x262   :  { %v4322_v30 = vmul.f32 %v1125_v29, %v4316_v26  ;;  %v1668_v31 = vsel %vm1667_vm1, %v4319_v27, -inf }
 0x263   :  { %1669 = vmax.xlane.f32.xlu0 %v1668_v31  ;;  %v1040_v32 = vpop.f32.mrf.mxu0  ;;  %v2955_v33 = vpop.f32.mrf.mxu1 }
 0x264   :  { %v1671_v36 = vsel %vm1667_vm1, %v4322_v30, -inf }
 0x265   :  { %v2936_v34 = vpop.f32.mrf.mxu0  ;;  %v1128_v35 = vpop.f32.mrf.mxu1 }
 0x267   :  { %1672 = vmax.xlane.f32.xlu0 %v1671_v36  ;;  %v2956_v37 = vpop.f32.mrf.mxu1  ;;  %v1780_v36 = vld [vmem:[%s4543_s4] sm:$0xf] }
 0x27f   :  { %v1213_v39 = vpop.f32.mrf.mxu0 }
 0x280   :  { %v4333_v41 = vmul.f32 %v1213_v39, %v4328_v38 }
 0x281   :  { %v2975_v42 = vpop.f32.mrf.mxu0  ;;  %v1301_v43 = vpop.f32.mrf.mxu1 }
 0x282   :  { %v4336_v44 = vmul.f32 %v1301_v43, %v4330_v40  ;;  %v1674_v45 = vsel %vm1667_vm1, %v4333_v41, -inf }
 0x283   :  { %1675 = vmax.xlane.f32.xlu1 %v1674_v45  ;;  %v1216_v46 = vpop.f32.mrf.mxu0  ;;  %v2995_v47 = vpop.f32.mrf.mxu1 }
 0x284   :  { %v1677_v50 = vsel %vm1667_vm1, %v4336_v44, -inf }
 0x285   :  { %v2976_v48 = vpop.f32.mrf.mxu0  ;;  %v1304_v49 = vpop.f32.mrf.mxu1 }
 0x287   :  { %1678 = vmax.xlane.f32.xlu1 %v1677_v50  ;;  %v2996_v51 = vpop.f32.mrf.mxu1 }
 0x29f   :  { %v1389_v53 = vpop.f32.mrf.mxu0 }
 0x2a0   :  { %v4347_v55 = vmul.f32 %v1389_v53, %v4342_v52 }
 0x2a1   :  { %v3015_v56 = vpop.f32.mrf.mxu0  ;;  %v1477_v57 = vpop.f32.mrf.mxu1 }
 0x2a2   :  { %v4350_v58 = vmul.f32 %v1477_v57, %v4344_v54  ;;  %v1680_v59 = vsel %vm1667_vm1, %v4347_v55, -inf }
 0x2a3   :  { %1681 = vmax.xlane.f32.xlu0 %v1680_v59  ;;  %v1392_v60 = vpop.f32.mrf.mxu0  ;;  %v3035_v61 = vpop.f32.mrf.mxu1 }
 0x2a4   :  { %v1683_v62 = vsel %vm1667_vm1, %v4350_v58, -inf }
 0x2a5   :  { %v3016_v63 = vpop.f32.mrf.mxu0  ;;  %1684 = vmax.xlane.f32.xlu1 %v1683_v62  ;;  %v1480_v0 = vpop.f32.mrf.mxu1  ;;  %v1784_v62 = vld [vmem:[%s4543_s4 + $0x10] sm:$0xf] }
 0x2a7   :  { %v3036_v1 = vpop.f32.mrf.mxu1 }
 0x2bf   :  { %v1565_v3 = vpop.f32.mrf.mxu0 }
 0x2c0   :  { %v4361_v5 = vmul.f32 %v1565_v3, %v4356_v2 }
 0x2c1   :  { %v3055_v7 = vpop.f32.mrf.mxu0  ;;  %v1653_v8 = vpop.f32.mrf.mxu1 }
 0x2c2   :  { %v4364_v9 = vmul.f32 %v1653_v8, %v4358_v4  ;;  %v1686_v10 = vsel %vm1667_vm1, %v4361_v5, -inf }
 0x2c3   :  { %1687 = vmax.xlane.f32.xlu0 %v1686_v10  ;;  %v1568_v11 = vpop.f32.mrf.mxu0  ;;  %v3075_v12 = vpop.f32.mrf.mxu1 }
 0x2c4   :  { %v1689_v13 = vsel %vm1667_vm1, %v4364_v9, -inf }
 0x2c5   :  { %v3056_v14 = vpop.f32.mrf.mxu0  ;;  %1690 = vmax.xlane.f32.xlu1 %v1689_v13  ;;  %v1656_v15 = vpop.f32.mrf.mxu1  ;;  %v1781_v13 = vld [vmem:[%s4543_s4 + $0x4] sm:$0xf] }
 0x2c6   :  { %v1840_v15 = vsel %vm1792_vm2, %v1781_v13, 0  ;;  %v3382_v13 = vld [vmem:[#allocation13] sm:$0xff]  }
 0x2c7   :  { %v3076_v17 = vpop.f32.mrf.mxu1 }
 0x2ec   :  { %v1670_v18 = vpop.xlane.xlu0 %1669 }
 0x2ed   :  { %v1692_v19 = vsub.f32 %v4319_v27, %v1670_v18 }
 0x2ef   :  { %v1700_v20 = vmul.f32 1.442695, %v1692_v19  ;;  %v1782_v19 = vld [vmem:[%s4543_s4 + $0x8] sm:$0xf] }
 0x2f0   :  { %v1673_v21 = vpop.xlane.xlu0 %1672 }
 0x2f1   :  { %3407 = vpow2.f32 %v1700_v20  ;;  %v1693_v22 = vsub.f32 %v4322_v30, %v1673_v21  ;;  %v1886_v21 = vsel %vm1792_vm2, %v1782_v19, 0 }
 0x2f3   :  { %v1702_v23 = vmul.f32 1.442695, %v1693_v22 }
 0x2f5   :  { %3409 = vpow2.f32 %v1702_v23 }
 0x2fe   :  { %v3408_v25 = vpop.eup %3407 }
 0x2ff   :  { %v4373_v28 = vmul.f32 %v3408_v25, %v4314_v24 }
 0x301   :  { %v1724_v29 = vsel %vm1667_vm1, %v4373_v28, 0.0 }
 0x302   :  { %v3410_v31 = vpop.eup %3409  ;;  %1725 = vadd.xlane.f32.xlu0 %v1724_v29 }
 0x303   :  { %v4378_v32 = vmul.f32 %v3410_v31, %v4316_v26  ;;  %v1794_v26 = vsel %vm1792_vm2, %v1780_v36, 0  ;;  %v1783_v31 = vld [vmem:[%s4543_s4 + $0xc] sm:$0xf] }
 0x304   :  { %3078 = vmatpush3.bf16.msra.mxu1 %v1794_v26 }
 0x305   :  { %v1727_v27 = vsel %vm1667_vm1, %v4378_v32, 0.0  ;;  %3083 = vmatprep.subr.bf16.mxu1 %v3693_v6 }
 0x306   :  { %1728 = vadd.xlane.f32.xlu1 %v1727_v27 }
 0x30c   :  { %v1676_v33 = vpop.xlane.xlu1 %1675 }
 0x30d   :  { %v1694_v30 = vsub.f32 %v4333_v41, %v1676_v33  ;;  %v1932_v33 = vsel %vm1792_vm2, %v1783_v31, 0 }
 0x30f   :  { %v1704_v34 = vmul.f32 1.442695, %v1694_v30 }
 0x310   :  { %v1679_v35 = vpop.xlane.xlu1 %1678 }
 0x311   :  { %3411 = vpow2.f32 %v1704_v34  ;;  %v1695_v24 = vsub.f32 %v4336_v44, %v1679_v35  ;;  %v1785_v35 = vld [vmem:[%s4543_s4 + $0x14] sm:$0xf] }
 0x312   :  { %v2024_v36 = vsel %vm1792_vm2, %v1785_v35, 0 }
 0x313   :  { %v1706_v37 = vmul.f32 1.442695, %v1695_v24 }
 0x315   :  { %3413 = vpow2.f32 %v1706_v37 }
 0x31e   :  { %v3412_v39 = vpop.eup %3411 }
 0x31f   :  { %v4390_v41 = vmul.f32 %v3412_v39, %v4328_v38 }
 0x321   :  { %v1730_v42 = vsel %vm1667_vm1, %v4390_v41, 0.0 }
 0x322   :  { %v3414_v43 = vpop.eup %3413  ;;  %1731 = vadd.xlane.f32.xlu0 %v1730_v42 }
 0x323   :  { %v4395_v44 = vmul.f32 %v3414_v43, %v4330_v40  ;;  %v1786_v43 = vld [vmem:[%s4543_s4 + $0x18] sm:$0xf] }
 0x325   :  { %v1733_v45 = vsel %vm1667_vm1, %v4395_v44, 0.0 }
 0x326   :  { %1734 = vadd.xlane.f32.xlu1 %v1733_v45 }
 0x32c   :  { %v1682_v46 = vpop.xlane.xlu0 %1681 }
 0x32d   :  { %v1696_v47 = vsub.f32 %v4347_v55, %v1682_v46  ;;  %v1787_v46 = vld [vmem:[%s4543_s4 + $0x1c] sm:$0xf] }
 0x32e   :  { %v1685_v48 = vpop.xlane.xlu1 %1684 }
 0x32f   :  { %v1708_v49 = vmul.f32 1.442695, %v1696_v47  ;;  %v1697_v38 = vsub.f32 %v4350_v58, %v1685_v48 }
 0x331   :  { %3415 = vpow2.f32 %v1708_v49  ;;  %v1710_v50 = vmul.f32 1.442695, %v1697_v38  ;;  %v2070_v49 = vsel %vm1792_vm2, %v1786_v43, 0 }
 0x333   :  { %3417 = vpow2.f32 %v1710_v50  ;;  %v2116_v50 = vsel %vm1792_vm2, %v1787_v46, 0 }
 0x33e   :  { %v3416_v51 = vpop.eup %3415 }
 0x33f   :  { %v4402_v53 = vmul.f32 %v3416_v51, %v4342_v52 }
 0x340   :  { %v3418_v40 = vpop.eup %3417 }
 0x341   :  { %v1736_v56 = vsel %vm1667_vm1, %v4402_v53, 0.0  ;;  %v4407_v57 = vmul.f32 %v3418_v40, %v4344_v54  ;;  %v1978_v54 = vsel %vm1792_vm2, %v1784_v62, 0  ;;  %v3368_v62 = vld [vmem:[#allocation14 + $0x30] sm:$0xff]  }
 0x342   :  { %1737 = vadd.xlane.f32.xlu0 %v1736_v56  ;;  %3102 = vmatpush3.bf16.msra.mxu0 %v1978_v54  ;;  %v3370_v54 = vld [vmem:[#allocation14 + $0x20] sm:$0xff]  }
 0x343   :  { %v1739_v55 = vsel %vm1667_vm1, %v4407_v57, 0.0  ;;  %3113 = vmatprep.subr.bf16.mxu0 %v3693_v6 }
 0x344   :  { %1740 = vadd.xlane.f32.xlu1 %v1739_v55 }
 0x34c   :  { %v1688_v58 = vpop.xlane.xlu0 %1687 }
 0x34d   :  { %v1698_v59 = vsub.f32 %v4361_v5, %v1688_v58 }
 0x34e   :  { %v1691_v60 = vpop.xlane.xlu1 %1690 }
 0x34f   :  { %v1712_v61 = vmul.f32 1.442695, %v1698_v59  ;;  %v1699_v52 = vsub.f32 %v4364_v9, %v1691_v60  ;;  %v3367_v59 = vld [vmem:[#allocation14 + $0x38] sm:$0xff]  }
 0x351   :  { %3419 = vpow2.f32 %v1712_v61  ;;  %v1714_v63 = vmul.f32 1.442695, %v1699_v52 }
 0x353   :  { %3421 = vpow2.f32 %v1714_v63  ;;  %v3369_v63 = vld [vmem:[#allocation14 + $0x28] sm:$0xff]  }
 0x35e   :  { %v3420_v0 = vpop.eup %3419 }
 0x35f   :  { %v4419_v1 = vmul.f32 %v3420_v0, %v4356_v2  ;;  %v3371_v0 = vld [vmem:[#allocation14 + $0x18] sm:$0xff]  }
 0x360   :  { %v3422_v3 = vpop.eup %3421 }
 0x361   :  { %v1742_v5 = vsel %vm1667_vm1, %v4419_v1, 0.0  ;;  %v4424_v7 = vmul.f32 %v3422_v3, %v4358_v4  ;;  %v3373_v3 = vld [vmem:[#allocation14 + $0x8] sm:$0xff]  }
 0x362   :  { %1743 = vadd.xlane.f32.xlu0 %v1742_v5  ;;  %v3374_v5 = vld [vmem:[#allocation14] sm:$0xff]  }
 0x363   :  { %v1745_v8 = vsel %vm1667_vm1, %v4424_v7, 0.0 }
 0x364   :  { %1746 = vadd.xlane.f32.xlu1 %v1745_v8  ;;  %v3375_v8 = vld [vmem:[#allocation13 + $0x38] sm:$0xff]  }
 0x38b   :  { %v1726_v9 = vpop.xlane.xlu0 %1725 }
 0x38c   :  { %v1748_v10 = vadd.f32 1e-13, %v1726_v9  ;;  %v3376_v9 = vld [vmem:[#allocation13 + $0x30] sm:$0xff]  }
 0x38e   :  { %3423 = vrcp.f32 %v1748_v10  ;;  %v3377_v10 = vld [vmem:[#allocation13 + $0x28] sm:$0xff]  }
 0x38f   :  { %v1729_v11 = vpop.xlane.xlu1 %1728 }
 0x390   :  { %v1749_v12 = vadd.f32 1e-13, %v1729_v11  ;;  %v3378_v11 = vld [vmem:[#allocation13 + $0x20] sm:$0xff]  }
 0x392   :  { %3425 = vrcp.f32 %v1749_v12  ;;  %v3380_v12 = vld [vmem:[#allocation13 + $0x10] sm:$0xff]  }
 0x39b   :  { %v3424_v2 = vpop.eup %3423 }
 0x39c   :  { %v1757_v14 = vmul.f32 %v3424_v2, %v4373_v28  ;;  %v3381_v2 = vld [vmem:[#allocation13 + $0x8] sm:$0xff]  }
 0x39e   :  { %v1772_v4 = vpack.c.bf16 %v1757_v14, %v1757_v14 }
 0x39f   :  { %v3426_v17 = vpop.eup %3425 }
 0x3a0   :  { %3080 = vmatmul.mubr.msk.bf16.vlgmr.msra.gmra.mxu1 %vm1788_vm3, %v1772_v4  ;;  %v1759_v18 = vmul.f32 %v3426_v17, %v4378_v32 }
 0x3a1   :  { %3084 = vmatpush3.bf16.msra.mxu1 %v1840_v15  ;;  %3085 = vmatprep.mubr.msk.bf16.mxu1 %vm3694_vm0, %v3693_v6 }
 0x3a2   :  { %3089 = vmatprep.subr.bf16.mxu1 %v3693_v6  ;;  %v1773_v20 = vpack.c.bf16 %v1759_v18, %v1759_v18  ;;  %v3383_v18 = vld [vmem:[#allocation16 + $0x38] sm:$0xff]  }
 0x3a8   :  { %3086 = vmatmul.mubr.msk.bf16.vlgmr.msra.gmra.mxu1 %vm1788_vm3, %v1773_v20 }
 0x3a9   :  { %3090 = vmatpush3.bf16.msra.mxu1 %v1886_v21  ;;  %3091 = vmatprep.mubr.msk.bf16.mxu1 %vm3694_vm0, %v3693_v6 }
 0x3aa   :  { %3095 = vmatprep.subr.bf16.mxu1 %v3693_v6 }
 0x3ab   :  { %v1732_v22 = vpop.xlane.xlu0 %1731 }
 0x3ac   :  { %v1750_v23 = vadd.f32 1e-13, %v1732_v22 }
 0x3ae   :  { %3427 = vrcp.f32 %v1750_v23 }
 0x3af   :  { %v1735_v25 = vpop.xlane.xlu1 %1734 }
 0x3b0   :  { %v1751_v28 = vadd.f32 1e-13, %v1735_v25 }
 0x3b2   :  { %3429 = vrcp.f32 %v1751_v28 }
 0x3bb   :  { %v3428_v29 = vpop.eup %3427 }
 0x3bc   :  { %v1761_v32 = vmul.f32 %v3428_v29, %v4390_v41 }
 0x3be   :  { %v1774_v27 = vpack.c.bf16 %v1761_v32, %v1761_v32 }
 0x3bf   :  { %v3430_v30 = vpop.eup %3429 }
 0x3c0   :  { %3092 = vmatmul.mubr.msk.bf16.vlgmr.msra.gmra.mxu1 %vm1788_vm3, %v1774_v27  ;;  %v1763_v34 = vmul.f32 %v3430_v30, %v4395_v44 }
 0x3c1   :  { %3096 = vmatpush3.bf16.msra.mxu1 %v1932_v33  ;;  %3097 = vmatprep.mubr.msk.bf16.mxu1 %vm3694_vm0, %v3693_v6 }
 0x3c2   :  { %3107 = vmatprep.subr.bf16.mxu1 %v3693_v6  ;;  %v1775_v24 = vpack.c.bf16 %v1763_v34, %v1763_v34 }
 0x3c8   :  { %3098 = vmatmul.mubr.msk.bf16.vlgmr.msra.gmra.mxu1 %vm1788_vm3, %v1775_v24 }
 0x3c9   :  { %3108 = vmatpush3.bf16.msra.mxu1 %v2024_v36  ;;  %3109 = vmatprep.mubr.msk.bf16.mxu1 %vm3694_vm0, %v3693_v6 }
 0x3ca   :  { %3119 = vmatprep.subr.bf16.mxu1 %v3693_v6 }
 0x3cb   :  { %v1738_v37 = vpop.xlane.xlu0 %1737 }
 0x3cc   :  { %v1752_v26 = vadd.f32 1e-13, %v1738_v37 }
 0x3cd   :  { %v1741_v39 = vpop.xlane.xlu1 %1740 }
 0x3ce   :  { %3431 = vrcp.f32 %v1752_v26  ;;  %v1753_v41 = vadd.f32 1e-13, %v1741_v39 }
 0x3d0   :  { %3433 = vrcp.f32 %v1753_v41 }
 0x3db   :  { %v3432_v42 = vpop.eup %3431 }
 0x3dc   :  { %v1765_v44 = vmul.f32 %v3432_v42, %v4402_v53 }
 0x3dd   :  { %v3434_v45 = vpop.eup %3433 }
 0x3de   :  { %v1776_v47 = vpack.c.bf16 %v1765_v44, %v1765_v44  ;;  %v1767_v48 = vmul.f32 %v3434_v45, %v4407_v57 }
 0x3e0   :  { %3104 = vmatmul.mubr.msk.bf16.vlgmr.msra.gmra.mxu0 %vm1788_vm3, %v1776_v47  ;;  %v1777_v38 = vpack.c.bf16 %v1767_v48, %v1767_v48 }
 0x3e1   :  { %3114 = vmatpush3.bf16.msra.mxu0 %v2070_v49  ;;  %3115 = vmatprep.mubr.msk.bf16.mxu0 %vm3694_vm0, %v3693_v6 }
 0x3e2   :  { %3110 = vmatmul.mubr.msk.bf16.vlgmr.msra.gmra.mxu1 %vm1788_vm3, %v1777_v38  ;;  %3125 = vmatprep.subr.bf16.mxu0 %v3693_v6 }
 0x3e3   :  { %3120 = vmatpush3.bf16.msra.mxu1 %v2116_v50  ;;  %3121 = vmatprep.mubr.msk.bf16.mxu1 %vm3694_vm0, %v3693_v6 }
 0x3e4   :  { %3145 = vmatprep.subr.bf16.mxu1 %v3693_v6 }
 0x3eb   :  { %v1744_v51 = vpop.xlane.xlu0 %1743 }
 0x3ec   :  { %v1754_v53 = vadd.f32 1e-13, %v1744_v51 }
 0x3ed   :  { %v1747_v40 = vpop.xlane.xlu1 %1746 }
 0x3ee   :  { %3435 = vrcp.f32 %v1754_v53  ;;  %v1755_v56 = vadd.f32 1e-13, %v1747_v40 }
 0x3f0   :  { %3437 = vrcp.f32 %v1755_v56 }
 0x3fb   :  { %v3436_v57 = vpop.eup %3435 }
 0x3fc   :  { %v1769_v55 = vmul.f32 %v3436_v57, %v4419_v1  ;;  %v3372_v1 = vld [vmem:[#allocation14 + $0x10] sm:$0xff]  }
 0x3fd   :  { %v3438_v58 = vpop.eup %3437 }
 0x3fe   :  { %v1778_v60 = vpack.c.bf16 %v1769_v55, %v1769_v55  ;;  %v1771_v61 = vmul.f32 %v3438_v58, %v4424_v7  ;;  %v2182_v7 = vpack.c.bf16 %v4094_v16, %v4094_v16  ;;  %v3379_v16 = vld [vmem:[#allocation13 + $0x18] sm:$0xff]  }
 0x400   :  { %3116 = vmatmul.mubr.msk.bf16.vlgmr.msra.gmra.mxu0 %vm1788_vm3, %v1778_v60  ;;  %v1779_v52 = vpack.c.bf16 %v1771_v61, %v1771_v61 }
 0x401   :  { %3126 = vmatpush3.bf16.msra.mxu0 %v3367_v59  ;;  %3141 = vmatprep.mubr.msk.bf16.mxu0 %vm3694_vm0, %v3693_v6 }
 0x402   :  { %3122 = vmatmul.mubr.msk.bf16.vlgmr.msra.gmra.mxu1 %vm1788_vm3, %v1779_v52  ;;  %3127 = vmatprep.subr.bf16.mxu0 %v3693_v6 }
 0x403   :  { %3161 = vmatprep.mubr.msk.bf16.mxu1 %vm3694_vm0, %v3693_v6  ;;  %3146 = vmatpush3.bf16.msra.mxu1 %v3375_v8 }
 0x404   :  { %3147 = vmatprep.subr.bf16.mxu1 %v3693_v6 }
 0x405   :  { %3128 = vmatpush3.bf16.msra.mxu0 %v3368_v62 }
 0x406   :  { %3129 = vmatprep.subr.bf16.mxu0 %v3693_v6 }
 0x407   :  { %3148 = vmatpush3.bf16.msra.mxu1 %v3376_v9 }
 0x408   :  { %3149 = vmatprep.subr.bf16.mxu1 %v3693_v6 }
 0x409   :  { %3130 = vmatpush3.bf16.msra.mxu0 %v3369_v63 }
 0x40a   :  { %3131 = vmatprep.subr.bf16.mxu0 %v3693_v6 }
 0x40b   :  { %3150 = vmatpush3.bf16.msra.mxu1 %v3377_v10 }
 0x40c   :  { %3151 = vmatprep.subr.bf16.mxu1 %v3693_v6 }
 0x40d   :  { %3132 = vmatpush3.bf16.msra.mxu0 %v3370_v54 }
 0x40e   :  { %3133 = vmatprep.subr.bf16.mxu0 %v3693_v6 }
 0x40f   :  { %3152 = vmatpush3.bf16.msra.mxu1 %v3378_v11 }
 0x410   :  { %3153 = vmatprep.subr.bf16.mxu1 %v3693_v6 }
 0x411   :  { %3134 = vmatpush3.bf16.msra.mxu0 %v3371_v0 }
 0x412   :  { %3135 = vmatprep.subr.bf16.mxu0 %v3693_v6 }
 0x413   :  { %3154 = vmatpush3.bf16.msra.mxu1 %v3379_v16 }
 0x414   :  { %3155 = vmatprep.subr.bf16.mxu1 %v3693_v6 }
 0x415   :  { %3136 = vmatpush3.bf16.msra.mxu0 %v3372_v1 }
 0x416   :  { %3137 = vmatprep.subr.bf16.mxu0 %v3693_v6 }
 0x417   :  { %3156 = vmatpush3.bf16.msra.mxu1 %v3380_v12 }
 0x418   :  { %3157 = vmatprep.subr.bf16.mxu1 %v3693_v6 }
 0x419   :  { %3138 = vmatpush3.bf16.msra.mxu0 %v3373_v3 }
 0x41a   :  { %3139 = vmatprep.subr.bf16.mxu0 %v3693_v6 }
 0x41b   :  { %3158 = vmatpush3.bf16.msra.mxu1 %v3381_v2 }
 0x41c   :  { %3159 = vmatprep.subr.bf16.mxu1 %v3693_v6 }
 0x41d   :  { %3140 = vmatpush3.bf16.msra.mxu0 %v3374_v5 }
 0x41e   :  { %3165 = vmatprep.subr.bf16.mxu0 %v3693_v6 }
 0x41f   :  { %3160 = vmatpush3.bf16.msra.mxu1 %v3382_v13 }
 0x420   :  { %3142 = vmatmul.mubr.bf16.vlgmr.msra.gmra.mxu0 %v2182_v7 }
 0x421   :  { %3181 = vmatprep.mubr.msk.bf16.mxu0 %vm3694_vm0, %v3693_v6  ;;  %3166 = vmatpush3.bf16.msra.mxu0 %v3383_v18 }
 0x422   :  { %3167 = vmatprep.subr.bf16.mxu0 %v3693_v6 }
 0x460   :  { %v1830_v14 = vpop.f32.mrf.mxu1 }
 0x461   :  { %v2158_v20 = vpack.c.bf16 %v1830_v14, %v1830_v14 }
 0x462   :  { %v3081_v4 = vpop.f32.mrf.mxu1 }
 0x463   :  { %v2295_v28 = vunpack.c.l.b16 %v2158_v20  ;;  %v3385_v20 = vld [vmem:[#allocation16 + $0x28] sm:$0xff]  }
 0x464   :  { %v1833_v15 = vpop.f32.mrf.mxu1 }
 0x466   :  { %v3082_v17 = vpop.f32.mrf.mxu1 }
 0x468   :  { %v1876_v19 = vpop.f32.mrf.mxu1 }
 0x469   :  { %v2159_v21 = vpack.c.bf16 %v1876_v19, %v1876_v19  ;;  %v3384_v19 = vld [vmem:[#allocation16 + $0x30] sm:$0xff]  }
 0x46a   :  { %v3087_v22 = vpop.f32.mrf.mxu1  ;;  %3168 = vmatpush3.bf16.msra.mxu0 %v3384_v19 }
 0x46b   :  { %v2296_v23 = vunpack.c.l.b16 %v2159_v21  ;;  %3169 = vmatprep.subr.bf16.mxu0 %v3693_v6  ;;  %v3386_v21 = vld [vmem:[#allocation16 + $0x20] sm:$0xff]   ;;  %v3387_v22 = vld [vmem:[#allocation16 + $0x18] sm:$0xff]  }
 0x46c   :  { %v1879_v25 = vpop.f32.mrf.mxu1 }
 0x46d   :  { %v2303_v29 = vrot.slane %v2296_v23, 7  ;;  %v3388_v23 = vld [vmem:[#allocation16 + $0x10] sm:$0xff]   ;;  %v3389_v25 = vld [vmem:[#allocation16 + $0x8] sm:$0xff]  }
 0x46e   :  { %v3088_v31 = vpop.f32.mrf.mxu1  ;;  %3170 = vmatpush3.bf16.msra.mxu0 %v3385_v20 }
 0x46f   :  { %v2305_v32 = vsel %vm2304_vm4, %v2303_v29, %v2295_v28  ;;  %3171 = vmatprep.subr.bf16.mxu0 %v3693_v6  ;;  %v3390_v28 = vld [vmem:[#allocation16] sm:$0xff]   ;;  %v2792_v31 = vld [vmem:[%s4550_s11] ss:$0 sm:$0xff] }
 0x472   :  { %3172 = vmatpush3.bf16.msra.mxu0 %v3386_v21 }
 0x473   :  { %3173 = vmatprep.subr.bf16.mxu0 %v3693_v6 }
 0x476   :  { %3174 = vmatpush3.bf16.msra.mxu0 %v3387_v22 }
 0x477   :  { %3175 = vmatprep.subr.bf16.mxu0 %v3693_v6 }
 0x47a   :  { %3176 = vmatpush3.bf16.msra.mxu0 %v3388_v23 }
 0x47b   :  { %3177 = vmatprep.subr.bf16.mxu0 %v3693_v6 }
 0x47e   :  { %3178 = vmatpush3.bf16.msra.mxu0 %v3389_v25 }
 0x47f   :  { %3179 = vmatprep.subr.bf16.mxu0 %v3693_v6 }
 0x480   :  { %v1922_v27 = vpop.f32.mrf.mxu1 }
 0x481   :  { %v2160_v47 = vpack.c.bf16 %v1922_v27, %v1922_v27 }
 0x482   :  { %v3093_v33 = vpop.f32.mrf.mxu1  ;;  %3180 = vmatpush3.bf16.msra.mxu0 %v3390_v28 }
 0x483   :  { %v2297_v38 = vunpack.c.l.b16 %v2160_v47 }
 0x484   :  { %v1925_v30 = vpop.f32.mrf.mxu1 }
 0x485   :  { %v2306_v40 = vrot.slane %v2297_v38, 6 }
 0x486   :  { %v3094_v34 = vpop.f32.mrf.mxu1 }
 0x487   :  { %v2308_v59 = vsel %vm2307_vm5, %v2306_v40, %v2305_v32  ;;  %v2545_v40 = vld [vmem:[#allocation4] sm:$0xff] }
 0x488   :  { %v1968_v35 = vpop.f32.mrf.mxu1 }
 0x489   :  { %v2161_v48 = vpack.c.bf16 %v1968_v35, %v1968_v35 }
 0x48a   :  { %v3099_v24 = vpop.f32.mrf.mxu1 }
 0x48b   :  { %v2298_v50 = vunpack.c.l.b16 %v2161_v48 }
 0x48c   :  { %v1971_v36 = vpop.f32.mrf.mxu1 }
 0x48d   :  { %v2309_v56 = vrot.slane %v2298_v50, 5 }
 0x48e   :  { %v3100_v37 = vpop.f32.mrf.mxu1 }
 0x48f   :  { %v2311_v61 = vsel %vm2310_vm6, %v2309_v56, %v2308_v59  ;;  %v3696_v37 = vmov -inf  }
 0x490   :  { %2426 = vst.msk [vmem:[#allocation3] sm:$0xff] %vm2425_vm11, %v3696_v37 }
 0x4a0   :  { %v2014_v26 = vpop.f32.mrf.mxu0 }
 0x4a1   :  { %v2162_v49 = vpack.c.bf16 %v2014_v26, %v2014_v26  ;;  %v2793_v26 = vld [vmem:[%s4552_s13] ss:$0 sm:$0xff]  ;;  %s3697_s13 = smov [#allocation17]  }
 0x4a2   :  { %v3105_v39 = vpop.f32.mrf.mxu0  ;;  %v2060_v41 = vpop.f32.mrf.mxu1  ;;  %s2584_s26 = sshll.u32 %s3697_s13, 4  ;;  %s2585_s26 = int_to_ptr.vmem [resolvable:$true] %s2584_s26 }
 0x4a3   :  { %v2163_v51 = vpack.c.bf16 %v2060_v41, %v2060_v41  ;;  %v2299_v53 = vunpack.c.l.b16 %v2162_v49  ;;  %s3587_s0 = scalar_lea.vmem %s2585_s26, 128  ;;  %p3592_p8 = scmp.lt.s32.totalorder %s2585_s26, %s2585_s26 }
 0x4a4   :  { %v2017_v42 = vpop.f32.mrf.mxu0  ;;  %v3111_v43 = vpop.f32.mrf.mxu1  ;;  %p3588_p7 = scmp.ne.s32.totalorder %s2585_s26, %s3587_s0  ;;  %p3593_p9 = scmp.lt.s32.totalorder %s3587_s0, %s3587_s0 }
 0x4a5   :  { %v2300_v57 = vunpack.c.l.b16 %v2163_v51  ;;  %v2312_v55 = vrot.slane %v2299_v53, 4 }
 0x4a6   :  { %v3106_v44 = vpop.f32.mrf.mxu0  ;;  %v2063_v45 = vpop.f32.mrf.mxu1  ;;  %p3594_p10 = por %p3593_p9, %p3592_p8 }
 0x4a7   :  { %v2315_v52 = vrot.slane %v2300_v57, 3  ;;  %v2314_v54 = vsel %vm2313_vm7, %v2312_v55, %v2311_v61  ;;  %v2543_v45 = vld [vmem:[#allocation3] sm:$0xff] }
 0x4a8   :  { %v3112_v46 = vpop.f32.mrf.mxu1  ;;  %p3595_p11 = pnand %p3594_p10, %p3588_p7 }
 0x4a9   :  { %v2317_v9 = vsel %vm2316_vm8, %v2315_v52, %v2314_v54 }
 0x4c0   :  { %v2106_v58 = vpop.f32.mrf.mxu0 }
 0x4c1   :  { %v2164_v60 = vpack.c.bf16 %v2106_v58, %v2106_v58 }
 0x4c2   :  { %v3117_v62 = vpop.f32.mrf.mxu0  ;;  %v2152_v63 = vpop.f32.mrf.mxu1 }
 0x4c3   :  { %v2301_v0 = vunpack.c.l.b16 %v2164_v60  ;;  %v2165_v1 = vpack.c.bf16 %v2152_v63, %v2152_v63 }
 0x4c4   :  { %v2109_v3 = vpop.f32.mrf.mxu0  ;;  %v3123_v5 = vpop.f32.mrf.mxu1 }
 0x4c5   :  { %v2318_v7 = vrot.slane %v2301_v0, 2  ;;  %v2302_v8 = vunpack.c.l.b16 %v2165_v1 }
 0x4c6   :  { %v3118_v10 = vpop.f32.mrf.mxu0  ;;  %v2155_v11 = vpop.f32.mrf.mxu1 }
 0x4c7   :  { %v2320_v16 = vsel %vm2319_vm9, %v2318_v7, %v2317_v9  ;;  %v2321_v12 = vrot.slane %v2302_v8, 1 }
 0x4c8   :  { %v3124_v2 = vpop.f32.mrf.mxu1 }
 0x4c9   :  { %v2323_v13 = vsel %vm2322_vm10, %v2321_v12, %v2320_v16 }
 0x4ca   :  { %v2324_v14 = vpack.c.b16 %v2323_v13, %v2323_v13 }
 0x4cc   :  { %3162 = vmatmul.mubr.bf16.vlgmr.msra.gmra.mxu1 %v2324_v14 }
 0x4e0   :  { %v2281_v4 = vpop.f32.mrf.mxu0 }
 0x4e2   :  { %v3143_v15 = vpop.f32.mrf.mxu0 }
 0x4e4   :  { %v2284_v17 = vpop.f32.mrf.mxu0 }
 0x4e6   :  { %v3144_v18 = vpop.f32.mrf.mxu0 }
 0x58c   :  { %v2408_v29 = vpop.f32.mrf.mxu1 }
 0x58d   :  { %v2409_v32 = vadd.f32 %v2408_v29, %v2281_v4 }
 0x58e   :  { %v3163_v27 = vpop.f32.mrf.mxu1 }
 0x58f   :  { %v2421_v33 = vadd.f32 %v2792_v31, %v2409_v32 }
 0x590   :  { %v2411_v30 = vpop.f32.mrf.mxu1 }
 0x591   :  { %3439 = vtanh.f32 %v2421_v33 }
 0x592   :  { %v3164_v34 = vpop.f32.mrf.mxu1 }
 0x59e   :  { %v3440_v35 = vpop.eup %3439 }
 0x59f   :  { %v2423_v24 = vpack.c.bf16 %v3440_v35, %v3440_v35 }
 0x5a1   :  { %2424 = vst [vmem:[#allocation2] sm:$0xf] %v2423_v24 }
 0x5a8   :  { %v2428_v36 = vld [vmem:[#allocation2] sm:$0xf] }
 0x5a9   :  { %3182 = vmatmul.mubr.bf16.vlgmr.msra.gmra.mxu0 %v2428_v36 }
 0x669   :  { %v2534_v39 = vpop.f32.mrf.mxu0 }
 0x66a   :  { %v2535_v41 = vadd.f32 %v2793_v26, %v2534_v39 }
 0x66b   :  { %v3183_v42 = vpop.f32.mrf.mxu0 }
 0x66c   :  { %2540 = vst [vmem:[#allocation17] sm:$0xff] %v2535_v41  ;;  %2541 = vmax.xlane.f32.xlu0 %v2535_v41 }
 0x66d   :  { %v2537_v43 = vpop.f32.mrf.mxu0 }
 0x66f   :  { %v3184_v44 = vpop.f32.mrf.mxu0 }
 0x6f5   :  { %v2542_v46 = vpop.xlane.xlu0 %2541 }
 0x6f6   :  { %v2544_v47 = vmax.f32 %v2543_v45, %v2542_v46 }
 0x6f8   :  { %v2546_v48 = vsub.f32 %v2543_v45, %v2544_v47  ;;  %2563 = vst.msk [vmem:[#allocation3] sm:$0xff] %vm2425_vm11, %v2544_v47  ;;  %2552 = vperm.xlu1 %3205, %v2544_v47  }
 0x6fa   :  { %v2547_v51 = vmul.f32 1.442695, %v2546_v48 }
 0x6ff   :  { %v2567_v61 = vld [vmem:[#allocation3] sm:$0xff] }
 0x773   :  { %v2553_v49 = vpop.permute.xlu1 %2552 }
 0x774   :  { %v2555_v6 = vsub.f32 %v2535_v41, %v2553_v49 }
 0x776   :  { %v2556_v38 = vmul.f32 1.442695, %v2555_v6 }
 0x778   :  { %3441 = vpow2.f32 %v2556_v38 }
 0x779   :  { %3443 = vpow2.f32 %v2547_v51 }
 0x785   :  { %v3442_v50 = vpop.eup %3441 }
 0x786   :  { %2558 = vadd.xlane.f32.xlu0 %v3442_v50  ;;  %v3444_v53 = vpop.eup %3443 }
 0x787   :  { %v2549_v56 = vmul.f32 %v3444_v53, %v2545_v40 }
 0x80f   :  { %v2559_v57 = vpop.xlane.xlu0 %2558 }
 0x810   :  { %v2560_v55 = vadd.f32 %v2559_v57, %v2549_v56 }
 0x812   :  { %2562 = vst.msk [vmem:[#allocation4] sm:$0xff] %vm2425_vm11, %v2560_v55 }
 0x819   :  { %v2568_v58 = vld [vmem:[#allocation4] sm:$0xff] }
 0x81a   :  { %3445 = vlog2.f32 %v2568_v58 }
 0x827   :  { %v3446_v59 = vpop.eup %3445 }
 0x828   :  { %v2570_v60 = vmul.f32 0.6931472, %v3446_v59 }
 0x82a   :  { %v2571_v52 = vadd.f32 %v2570_v60, %v2567_v61 }
 0x82b   :  { %3598 = shalt.err (!%p3595_p11)
}
 0x82c   :  { %2587 = dma.vmem_to_hbm [thread:$0]  %s2585_s26, 128, %s4553_s14, [#allocation7]   ;;  %2574 = vperm.xlu0 %3206, %v2571_v52  }
 0x82d   :  { %s3698_s27 = smov [#allocation21]  }
 0x82e   :  { %s2614_s30 = sshll.u32 %s3698_s27, 4  ;;  %s2615_s30 = int_to_ptr.vmem [resolvable:$true] %s2614_s30 }
 0x82f   :  { %s3607_s5 = scalar_lea.vmem %s2615_s30, 128  ;;  %p3612_p13 = scmp.lt.s32.totalorder %s2615_s30, %s2615_s30 }
 0x830   :  { %p3608_p12 = scmp.ne.s32.totalorder %s2615_s30, %s3607_s5  ;;  %p3613_p0 = scmp.lt.s32.totalorder %s3607_s5, %s3607_s5 }
 0x832   :  { %p3614_p1 = por %p3613_p0, %p3612_p13 }
 0x834   :  { %p3615_p2 = pnand %p3614_p1, %p3608_p12 }
 0x836   :  { %3618 = shalt.err (!%p3615_p2)
}
 0x837   :  { %2617 = dma.vmem_to_hbm [thread:$0]  %s2615_s30, 128, %s4556_s17, [#allocation22]  }
 0x838   :  { %s3699_s9 = smov [#allocation18]   ;;  %s3700_s12 = smov [#allocation20]  }
 0x839   :  { %s2594_s19 = sshll.u32 %s3699_s9, 4  ;;  %s2604_s28 = sshll.u32 %s3700_s12, 4  ;;  %s2595_s19 = int_to_ptr.vmem [resolvable:$true] %s2594_s19  ;;  %s2605_s28 = int_to_ptr.vmem [resolvable:$true] %s2604_s28 }
 0x83a   :  { %s3627_s14 = scalar_lea.vmem %s2595_s19, 128  ;;  %p3632_p4 = scmp.lt.s32.totalorder %s2595_s19, %s2595_s19 }
 0x83b   :  { %p3628_p3 = scmp.ne.s32.totalorder %s2595_s19, %s3627_s14  ;;  %p3633_p5 = scmp.lt.s32.totalorder %s3627_s14, %s3627_s14 }
 0x83d   :  { %p3634_p6 = por %p3633_p5, %p3632_p4 }
 0x83f   :  { %p3635_p7 = pnand %p3634_p6, %p3628_p3 }
 0x8a7   :  { %v2575_v62 = vpop.permute.xlu0 %2574 }
 0x8a8   :  { %2577 = vst [vmem:[#allocation18] sm:$0xff] %v2575_v62 }
 0x8a9   :  { %3638 = shalt.err (!%p3635_p7)
}
 0x8aa   :  { %2597 = dma.vmem_to_hbm [thread:$0]  %s2595_s19, 128, %s4554_s15, [#allocation19]  }
 0x8ab   :  { %s3647_s17 = scalar_lea.vmem %s2605_s28, 128  ;;  %p3652_p9 = scmp.lt.s32.totalorder %s2605_s28, %s2605_s28 }
 0x8ac   :  { %p3648_p8 = scmp.ne.s32.totalorder %s2605_s28, %s3647_s17  ;;  %p3653_p10 = scmp.lt.s32.totalorder %s3647_s17, %s3647_s17 }
 0x8ae   :  { %p3654_p11 = por %p3653_p10, %p3652_p9 }
 0x8b0   :  { %p3655_p12 = pnand %p3654_p11, %p3648_p8 }
 0x8b2   :  { %3658 = shalt.err (!%p3655_p12)
}
 0x8b3   :  { %2607 = dma.vmem_to_hbm [thread:$0]  %s2605_s28, 128, %s4555_s16, [#allocation19]  }
 0x8b4   :  { %3675 = dma.done.wait [#allocation7], 128  }
 0x8b5   :  { %3676 = vsyncadd [#allocation7], 4294967168 }
 0x8b6   :  { %3677 = dma.done.wait [#allocation19], 256  }
 0x8b7   :  { %3678 = vsyncadd [#allocation19], 4294967040 }
 0x8b8   :  { %3679 = dma.done.wait [#allocation22], 128  }
 0x8b9   :  { %3680 = vsyncadd [#allocation22], 4294967168 }
 0x8ba   :  { %2630 = vsyncpa [#allocation6], 1 }
 0x8bb   :  { %2631 = vsyncpa [#allocation9], 1 }
 0x8bc   :  { %2632 = vsyncpa [#allocation12], 1 }
 0x8bd   :  { %2633 = vsyncpa [#allocation15], 1 }
 0x8be   :  { %2634 = vsyncpa [#allocation7], 1 }
 0x8bf   :  { %2635 = vsyncpa [#allocation19], 1 }
 0x8c0   :  { %2636 = vsyncpa [#allocation22], 1 }

</bundles_post_ra>
